<compile_context>
chip_gen: v7x
topology: tpu7x:2x2x1
jax: 0.10.0
libtpu: 0.0.40
codegen_flags: <defaults>
</compile_context>

<pallas_src>
import math
from functools import partial

import jax
import jax.numpy as jnp
from jax.experimental import pallas as pl
from jax.experimental.pallas import tpu as pltpu

VMEM = pltpu.MemorySpace.VMEM

# ----- architecture constants fixed by the PyTorch module -----
C_IN = 7
OC1, KH1, STR1, DIL1, POOL1 = 16, 15, 3, 2, 10
OC2, KH2, POOL2 = 32, 10, 2
LSTM_IN, HID = 32, 256
FC1_OUT = 100


# --------------------------- fused Pallas kernel ---------------------------

def _make_fused_kernel(B, W, H1p, H2, T, R1p):
    """Builds the fused kernel for static dims.

    Row layouts (all static Python bookkeeping):
      p1     : (POOL1*R1p, 128)  rows = p*R1p + (w*H1p*B + g*B + b), feats (c*KH1+kh) padded 105->128
      a1_scr : (R1p, 16)         rows = w*H1p*B + g*B + b   (pooled conv1 output, post bias+ReLU)
      z2_scr : (H2*B, 32)        rows = oh2*B + b           (conv2 output, post bias+ReLU)
      seq_scr: (T*B, 32)         rows = t*B + b             (LSTM input sequence)
    """
    H2B = H2 * B

    def kernel(p1_ref, w1p_ref, b1_ref, w2k_ref, b2_ref,
               wih_ref, whh_ref, bl_ref,
               fcw_ref, fcb_ref,
               out_ref,
               y1_scr, a1_scr, z2_scr, seq_scr, gx_scr):
        # ---- conv1: ONE matmul over all pool positions, then max over the
        #      POOL1 aligned row blocks, then bias + ReLU once.
        y1_scr[...] = jnp.dot(p1_ref[...], w1p_ref[...],
                              preferred_element_type=jnp.float32)
        pooled = y1_scr[pl.ds(0, R1p), :]
        for p in range(1, POOL1):
            pooled = jnp.maximum(pooled, y1_scr[pl.ds(p * R1p, R1p), :])
        a1_scr[...] = jnp.maximum(pooled + b1_ref[...], 0.0)

        # ---- conv2: in-VMEM im2col (lane concat of (H2*B,16) row blocks) + ONE matmul.
        pieces = []
        for kh in range(KH2):
            for w in range(W):
                start = w * (H1p * B) + kh * B
                pieces.append(a1_scr[pl.ds(start, H2B), :])
        patch2 = jnp.concatenate(pieces, axis=1)                      # (H2*B, KH2*W*16)
        z2 = jnp.dot(patch2, w2k_ref[...], preferred_element_type=jnp.float32)
        z2_scr[...] = jnp.maximum(z2 + b2_ref[...], 0.0)              # rows (oh2, b)

        # ---- MaxPool2d((2,1)) over oh2 -> LSTM input sequence, rows (t, b)
        for t in range(T):
            s = jnp.maximum(z2_scr[pl.ds((POOL2 * t) * B, B), :],
                            z2_scr[pl.ds((POOL2 * t + 1) * B, B), :])
            seq_scr[pl.ds(t * B, B), :] = s

        # ---- LSTM: batched input projection for ALL timesteps (one matmul), then
        #      the recurrence with only the (B,256)x(256,1024) hidden matmuls.
        gx_scr[...] = (jnp.dot(seq_scr[...], wih_ref[...],
                               preferred_element_type=jnp.float32) + bl_ref[...])
        c = None
        h = None
        for t in range(T):
            g = gx_scr[pl.ds(t * B, B), :]                            # (B, 4*HID)
            if t > 0:                                                 # h0 == 0 -> skip at t=0
                g = g + jnp.dot(h, whh_ref[...], preferred_element_type=jnp.float32)
            i_g = jax.nn.sigmoid(g[:, 0 * HID:1 * HID])
            c_g = jnp.tanh(g[:, 2 * HID:3 * HID])
            if t == 0:
                c = i_g * c_g                                         # f*c0 term is zero
            else:
                f_g = jax.nn.sigmoid(g[:, 1 * HID:2 * HID])
                c = f_g * c + i_g * c_g
            if t < T - 1:                                             # h is dead after last step
                o_g = jax.nn.sigmoid(g[:, 3 * HID:4 * HID])
                h = o_g * jnp.tanh(c)

        # ---- fused fc (Linear(256,100) ∘ Linear(100,n_asset), no activation between)
        out_ref[...] = (jnp.dot(c, fcw_ref[...], preferred_element_type=jnp.float32)
                        + fcb_ref[...])

    return kernel


# --------------------------- parameters (PyTorch shapes) ---------------------------

def init_params(key, n_asset=2):
    ks = jax.random.split(key, 12)

    def u(k, shape, fan_in):
        bound = 1.0 / math.sqrt(fan_in)
        return jax.random.uniform(k, shape, jnp.float32, -bound, bound)

    p = {}
    p["w1"] = u(ks[0], (OC1, C_IN, KH1, 1), C_IN * KH1)                 # Conv2d(7,16,(15,1))
    p["b1"] = u(ks[1], (OC1,), C_IN * KH1)
    p["w2"] = u(ks[2], (OC2, OC1, KH2, n_asset), OC1 * KH2 * n_asset)   # Conv2d(16,32,(10,n_asset))
    p["b2"] = u(ks[3], (OC2,), OC1 * KH2 * n_asset)
    p["w_ih"] = u(ks[4], (4 * HID, LSTM_IN), HID)                        # LSTM(32 -> 256)
    p["w_hh"] = u(ks[5], (4 * HID, HID), HID)
    p["b_ih"] = u(ks[6], (4 * HID,), HID)
    p["b_hh"] = u(ks[7], (4 * HID,), HID)
    p["fc1_w"] = u(ks[8], (FC1_OUT, HID), HID)                           # Linear(256,100)
    p["fc1_b"] = u(ks[9], (FC1_OUT,), HID)
    p["fc2_w"] = u(ks[10], (n_asset, FC1_OUT), FC1_OUT)                  # Linear(100,n_asset)
    p["fc2_b"] = u(ks[11], (n_asset,), FC1_OUT)
    return p


def prepare_params(params, n_asset=2):
    """One-time re-layout of PyTorch-shaped weights into kernel-ready matrices."""
    K1 = C_IN * KH1
    K1p = ((K1 + 127) // 128) * 128
    kp = {}
    # conv1 weight: (oc, c, kh, 1) -> (K1, 16), zero-padded to 128 contraction rows.
    kp["w1p"] = jnp.pad(params["w1"].reshape(OC1, K1).T, ((0, K1p - K1), (0, 0)))
    kp["b1"] = params["b1"].reshape(1, OC1)
    # conv2 weight: (oc, c2, kh, kw) -> rows ordered (kh, kw, c2) to match the
    # in-kernel patch2 lane concat order.
    kp["w2k"] = params["w2"].transpose(2, 3, 1, 0).reshape(KH2 * n_asset * OC1, OC2)
    kp["b2"] = params["b2"].reshape(1, OC2)
    kp["wih_t"] = params["w_ih"].T                                       # (32, 1024), gates i,f,g,o
    kp["whh_t"] = params["w_hh"].T                                       # (256, 1024)
    kp["bl"] = (params["b_ih"] + params["b_hh"]).reshape(1, 4 * HID)
    # Fuse the two bias-affine Linear layers (no nonlinearity between them):
    #   fc2(fc1(x)) = x @ (fc2_w @ fc1_w)^T + (fc1_b @ fc2_w^T + fc2_b)
    kp["fcw_t"] = (params["fc2_w"] @ params["fc1_w"]).T                  # (256, n_asset)
    kp["fcb"] = (params["fc2_w"] @ params["fc1_b"] + params["fc2_b"]).reshape(1, n_asset)
    return kp


# --------------------------- forward ---------------------------

def dnn_forward(kp, x, n_asset=2):
    B, C, H, W = x.shape  # NCHW, C = 7, W = n_asset
    assert C == C_IN and W == n_asset

    H1 = (H - (KH1 - 1) * DIL1 - 1) // STR1 + 1     # conv1 output height
    H1p = H1 // POOL1                               # after MaxPool2d((10,1))
    H2 = H1p - KH2 + 1                              # conv2 output height
    T = H2 // POOL2                                 # LSTM sequence length
    assert H1p >= KH2 and T >= 1

    R1 = W * H1p * B                                # pooled conv1 rows (w, g, b)
    R1p = ((R1 + 7) // 8) * 8                       # sublane-aligned pool blocks
    K1 = C_IN * KH1
    K1p = ((K1 + 127) // 128) * 128                 # lane-padded contraction dim

    # conv1 im2col patches, rows ordered (pool_pos, w, g, b) so the kernel's pool
    # is a max over POOL1 aligned row blocks feeding ONE matmul.
    # TODO(synk): the dilated+strided im2col gather stays as one small plain-JAX op
    # inside the same jit (no clean single Pallas construct for this access pattern).
    h_idx = (jnp.arange(H1p * POOL1)[:, None] * STR1
             + jnp.arange(KH1)[None, :] * DIL1)                       # (H1p*POOL1, KH1)
    pat = x[:, :, h_idx, :]                                           # (B, C, H1p*P1, KH1, W)
    pat = pat.reshape(B, C, H1p, POOL1, KH1, W)                       # [b, c, g, p, kh, w]
    pat = pat.transpose(3, 5, 2, 0, 1, 4)                             # [p, w, g, b, c, kh]
    pat = pat.reshape(POOL1, R1, K1)
    pat = jnp.pad(pat, ((0, 0), (0, R1p - R1), (0, K1p - K1)))
    p1 = pat.reshape(POOL1 * R1p, K1p)

    kernel = _make_fused_kernel(B, W, H1p, H2, T, R1p)
    return pl.pallas_call(
        kernel,
        out_shape=jax.ShapeDtypeStruct((B, n_asset), jnp.float32),
        in_specs=[pl.BlockSpec(memory_space=VMEM)] * 10,
        out_specs=pl.BlockSpec(memory_space=VMEM),
        scratch_shapes=[
            pltpu.VMEM((POOL1 * R1p, OC1), jnp.float32),   # conv1 pre-pool matmul result
            pltpu.VMEM((R1p, OC1), jnp.float32),           # pooled conv1 output
            pltpu.VMEM((H2 * B, OC2), jnp.float32),        # conv2 output (pre-pool)
            pltpu.VMEM((T * B, LSTM_IN), jnp.float32),     # LSTM input sequence
            pltpu.VMEM((T * B, 4 * HID), jnp.float32),     # batched input-gate projections
        ],
    )(p1, kp["w1p"], kp["b1"], kp["w2k"], kp["b2"],
      kp["wih_t"], kp["whh_t"], kp["bl"],
      kp["fcw_t"], kp["fcb"])


# --------------------------- pure-JAX reference (for correctness check) ---------------------------

def dnn_reference(params, x, n_asset=2):
    dn = ("NCHW", "OIHW", "NCHW")
    z = jax.lax.conv_general_dilated(x, params["w1"], window_strides=(STR1, 1),
                                     padding="VALID", rhs_dilation=(DIL1, 1),
                                     dimension_numbers=dn)
    z = jnp.maximum(z + params["b1"][None, :, None, None], 0.0)
    B, C1, H1, W = z.shape
    H1p = H1 // POOL1
    z = z[:, :, :H1p * POOL1, :].reshape(B, C1, H1p, POOL1, W).max(axis=3)
    z = jax.lax.conv_general_dilated(z, params["w2"], window_strides=(1, 1),
                                     padding="VALID", dimension_numbers=dn)
    z = jnp.maximum(z + params["b2"][None, :, None, None], 0.0)
    _, C2, H2, W2 = z.shape                      # W2 == 1
    T = H2 // POOL2
    z = z[:, :, :T * POOL2, :].reshape(B, C2, T, POOL2, W2).max(axis=3)
    seq = z.squeeze(3).transpose(0, 2, 1)        # (B, T, 32)

    h = jnp.zeros((B, HID), jnp.float32)
    c = jnp.zeros((B, HID), jnp.float32)
    for t in range(T):
        g = (seq[:, t, :] @ params["w_ih"].T + params["b_ih"]
             + h @ params["w_hh"].T + params["b_hh"])
        i_g = jax.nn.sigmoid(g[:, 0 * HID:1 * HID])
        f_g = jax.nn.sigmoid(g[:, 1 * HID:2 * HID])
        c_g = jnp.tanh(g[:, 2 * HID:3 * HID])
        o_g = jax.nn.sigmoid(g[:, 3 * HID:4 * HID])
        c = f_g * c + i_g * c_g
        h = o_g * jnp.tanh(c)
    out = c @ params["fc1_w"].T + params["fc1_b"]
    return out @ params["fc2_w"].T + params["fc2_b"]


if __name__ == "__main__":
    n_asset = 2
    # H must satisfy the conv/pool chain: H=416 -> H1=130 -> pool 13 -> H2=4 -> pool -> T=2
    B, C, H, W = 2, 7, 416, n_asset
    key = jax.random.PRNGKey(0)
    kx, kw = jax.random.split(key)
    x = jax.random.normal(kx, (B, C, H, W), jnp.float32)
    params = init_params(kw, n_asset)
    kparams = prepare_params(params, n_asset)

    fwd = jax.jit(partial(dnn_forward, n_asset=n_asset))
    out = jax.block_until_ready(fwd(kparams, x))
    assert out.shape == (B, n_asset) and out.dtype == jnp.float32

    ref = jax.block_until_ready(dnn_reference(params, x, n_asset))
    assert jnp.allclose(out, ref, atol=2e-3, rtol=2e-3), (out, ref)

    print("KERNEL_OK")
</pallas_src>

<mosaic_0001>
module attributes {stable_mosaic.version = 11 : i64} {
  func.func @kernel(%arg0: memref<560x128xf32, #tpu.memory_space<vmem>>, %arg1: memref<128x16xf32, #tpu.memory_space<vmem>>, %arg2: memref<1x16xf32, #tpu.memory_space<vmem>>, %arg3: memref<320x32xf32, #tpu.memory_space<vmem>>, %arg4: memref<1x32xf32, #tpu.memory_space<vmem>>, %arg5: memref<32x1024xf32, #tpu.memory_space<vmem>>, %arg6: memref<256x1024xf32, #tpu.memory_space<vmem>>, %arg7: memref<1x1024xf32, #tpu.memory_space<vmem>>, %arg8: memref<256x2xf32, #tpu.memory_space<vmem>>, %arg9: memref<1x2xf32, #tpu.memory_space<vmem>>, %arg10: memref<2x2xf32, #tpu.memory_space<vmem>>, %arg11: memref<560x16xf32, #tpu.memory_space<vmem>>, %arg12: memref<56x16xf32, #tpu.memory_space<vmem>>, %arg13: memref<8x32xf32, #tpu.memory_space<vmem>>, %arg14: memref<4x32xf32, #tpu.memory_space<vmem>>, %arg15: memref<4x1024xf32, #tpu.memory_space<vmem>>) attributes {dimension_semantics = [], scalar_prefetch = 0 : i64, scratch_operands = 5 : i64, tpu.core_type = #tpu.core_type<tc>} {
    %c0 = arith.constant 0 : index
    %c0_0 = arith.constant 0 : index
    %0 = vector.load %arg0[%c0, %c0_0] : memref<560x128xf32, #tpu.memory_space<vmem>>, vector<560x128xf32>
    %c0_1 = arith.constant 0 : index
    %c0_2 = arith.constant 0 : index
    %1 = vector.load %arg1[%c0_1, %c0_2] : memref<128x16xf32, #tpu.memory_space<vmem>>, vector<128x16xf32>
    %cst = arith.constant dense<0.000000e+00> : vector<560x16xf32>
    %2 = tpu.matmul %0, %1, %cst {dimension_numbers = #tpu.dot_dimension_numbers<[1], [0], [0], [1], [0, 0, 1, 1], [], []>} : vector<560x128xf32>, vector<128x16xf32>, vector<560x16xf32> -> vector<560x16xf32>
    %c0_3 = arith.constant 0 : index
    %c0_4 = arith.constant 0 : index
    %3 = vector.load %arg11[%c0_3, %c0_4] : memref<560x16xf32, #tpu.memory_space<vmem>>, vector<560x16xf32>
    tpu.vector_store %arg11[%c0_3, %c0_4], %2 {strides = array<i32>} : memref<560x16xf32, #tpu.memory_space<vmem>>, vector<560x16xf32>,
    %c0_5 = arith.constant 0 : index
    %c0_6 = arith.constant 0 : index
    %4 = vector.load %arg11[%c0_5, %c0_6] : memref<560x16xf32, #tpu.memory_space<vmem>>, vector<56x16xf32>
    %c56 = arith.constant 56 : index
    %c0_7 = arith.constant 0 : index
    %5 = vector.load %arg11[%c56, %c0_7] : memref<560x16xf32, #tpu.memory_space<vmem>>, vector<56x16xf32>
    %6 = arith.maximumf %4, %5 : vector<56x16xf32>
    %c112 = arith.constant 112 : index
    %c0_8 = arith.constant 0 : index
    %7 = vector.load %arg11[%c112, %c0_8] : memref<560x16xf32, #tpu.memory_space<vmem>>, vector<56x16xf32>
    %8 = arith.maximumf %6, %7 : vector<56x16xf32>
    %c168 = arith.constant 168 : index
    %c0_9 = arith.constant 0 : index
    %9 = vector.load %arg11[%c168, %c0_9] : memref<560x16xf32, #tpu.memory_space<vmem>>, vector<56x16xf32>
    %10 = arith.maximumf %8, %9 : vector<56x16xf32>
    %c224 = arith.constant 224 : index
    %c0_10 = arith.constant 0 : index
    %11 = vector.load %arg11[%c224, %c0_10] : memref<560x16xf32, #tpu.memory_space<vmem>>, vector<56x16xf32>
    %12 = arith.maximumf %10, %11 : vector<56x16xf32>
    %c280 = arith.constant 280 : index
    %c0_11 = arith.constant 0 : index
    %13 = vector.load %arg11[%c280, %c0_11] : memref<560x16xf32, #tpu.memory_space<vmem>>, vector<56x16xf32>
    %14 = arith.maximumf %12, %13 : vector<56x16xf32>
    %c336 = arith.constant 336 : index
    %c0_12 = arith.constant 0 : index
    %15 = vector.load %arg11[%c336, %c0_12] : memref<560x16xf32, #tpu.memory_space<vmem>>, vector<56x16xf32>
    %16 = arith.maximumf %14, %15 : vector<56x16xf32>
    %c392 = arith.constant 392 : index
    %c0_13 = arith.constant 0 : index
    %17 = vector.load %arg11[%c392, %c0_13] : memref<560x16xf32, #tpu.memory_space<vmem>>, vector<56x16xf32>
    %18 = arith.maximumf %16, %17 : vector<56x16xf32>
    %c448 = arith.constant 448 : index
    %c0_14 = arith.constant 0 : index
    %19 = vector.load %arg11[%c448, %c0_14] : memref<560x16xf32, #tpu.memory_space<vmem>>, vector<56x16xf32>
    %20 = arith.maximumf %18, %19 : vector<56x16xf32>
    %c504 = arith.constant 504 : index
    %c0_15 = arith.constant 0 : index
    %21 = vector.load %arg11[%c504, %c0_15] : memref<560x16xf32, #tpu.memory_space<vmem>>, vector<56x16xf32>
    %22 = arith.maximumf %20, %21 : vector<56x16xf32>
    %c0_16 = arith.constant 0 : index
    %c0_17 = arith.constant 0 : index
    %23 = vector.load %arg2[%c0_16, %c0_17] : memref<1x16xf32, #tpu.memory_space<vmem>>, vector<1x16xf32>
    %24 = vector.broadcast %23 : vector<1x16xf32> to vector<56x16xf32>
    %25 = arith.addf %22, %24 : vector<56x16xf32>
    %cst_18 = arith.constant 0.000000e+00 : f32
    %26 = vector.broadcast %cst_18 : f32 to vector<56x16xf32>
    %27 = arith.maximumf %25, %26 : vector<56x16xf32>
    %c0_19 = arith.constant 0 : index
    %c0_20 = arith.constant 0 : index
    %28 = vector.load %arg12[%c0_19, %c0_20] : memref<56x16xf32, #tpu.memory_space<vmem>>, vector<56x16xf32>
    tpu.vector_store %arg12[%c0_19, %c0_20], %27 {strides = array<i32>} : memref<56x16xf32, #tpu.memory_space<vmem>>, vector<56x16xf32>,
    %c0_21 = arith.constant 0 : index
    %c0_22 = arith.constant 0 : index
    %29 = vector.load %arg12[%c0_21, %c0_22] : memref<56x16xf32, #tpu.memory_space<vmem>>, vector<8x16xf32>
    %c26 = arith.constant 26 : index
    %c0_23 = arith.constant 0 : index
    %30 = vector.load %arg12[%c26, %c0_23] : memref<56x16xf32, #tpu.memory_space<vmem>>, vector<8x16xf32>
    %c2 = arith.constant 2 : index
    %c0_24 = arith.constant 0 : index
    %31 = vector.load %arg12[%c2, %c0_24] : memref<56x16xf32, #tpu.memory_space<vmem>>, vector<8x16xf32>
    %c28 = arith.constant 28 : index
    %c0_25 = arith.constant 0 : index
    %32 = vector.load %arg12[%c28, %c0_25] : memref<56x16xf32, #tpu.memory_space<vmem>>, vector<8x16xf32>
    %c4 = arith.constant 4 : index
    %c0_26 = arith.constant 0 : index
    %33 = vector.load %arg12[%c4, %c0_26] : memref<56x16xf32, #tpu.memory_space<vmem>>, vector<8x16xf32>
    %c30 = arith.constant 30 : index
    %c0_27 = arith.constant 0 : index
    %34 = vector.load %arg12[%c30, %c0_27] : memref<56x16xf32, #tpu.memory_space<vmem>>, vector<8x16xf32>
    %c6 = arith.constant 6 : index
    %c0_28 = arith.constant 0 : index
    %35 = vector.load %arg12[%c6, %c0_28] : memref<56x16xf32, #tpu.memory_space<vmem>>, vector<8x16xf32>
    %c32 = arith.constant 32 : index
    %c0_29 = arith.constant 0 : index
    %36 = vector.load %arg12[%c32, %c0_29] : memref<56x16xf32, #tpu.memory_space<vmem>>, vector<8x16xf32>
    %c8 = arith.constant 8 : index
    %c0_30 = arith.constant 0 : index
    %37 = vector.load %arg12[%c8, %c0_30] : memref<56x16xf32, #tpu.memory_space<vmem>>, vector<8x16xf32>
    %c34 = arith.constant 34 : index
    %c0_31 = arith.constant 0 : index
    %38 = vector.load %arg12[%c34, %c0_31] : memref<56x16xf32, #tpu.memory_space<vmem>>, vector<8x16xf32>
    %c10 = arith.constant 10 : index
    %c0_32 = arith.constant 0 : index
    %39 = vector.load %arg12[%c10, %c0_32] : memref<56x16xf32, #tpu.memory_space<vmem>>, vector<8x16xf32>
    %c36 = arith.constant 36 : index
    %c0_33 = arith.constant 0 : index
    %40 = vector.load %arg12[%c36, %c0_33] : memref<56x16xf32, #tpu.memory_space<vmem>>, vector<8x16xf32>
    %c12 = arith.constant 12 : index
    %c0_34 = arith.constant 0 : index
    %41 = vector.load %arg12[%c12, %c0_34] : memref<56x16xf32, #tpu.memory_space<vmem>>, vector<8x16xf32>
    %c38 = arith.constant 38 : index
    %c0_35 = arith.constant 0 : index
    %42 = vector.load %arg12[%c38, %c0_35] : memref<56x16xf32, #tpu.memory_space<vmem>>, vector<8x16xf32>
    %c14 = arith.constant 14 : index
    %c0_36 = arith.constant 0 : index
    %43 = vector.load %arg12[%c14, %c0_36] : memref<56x16xf32, #tpu.memory_space<vmem>>, vector<8x16xf32>
    %c40 = arith.constant 40 : index
    %c0_37 = arith.constant 0 : index
    %44 = vector.load %arg12[%c40, %c0_37] : memref<56x16xf32, #tpu.memory_space<vmem>>, vector<8x16xf32>
    %c16 = arith.constant 16 : index
    %c0_38 = arith.constant 0 : index
    %45 = vector.load %arg12[%c16, %c0_38] : memref<56x16xf32, #tpu.memory_space<vmem>>, vector<8x16xf32>
    %c42 = arith.constant 42 : index
    %c0_39 = arith.constant 0 : index
    %46 = vector.load %arg12[%c42, %c0_39] : memref<56x16xf32, #tpu.memory_space<vmem>>, vector<8x16xf32>
    %c18 = arith.constant 18 : index
    %c0_40 = arith.constant 0 : index
    %47 = vector.load %arg12[%c18, %c0_40] : memref<56x16xf32, #tpu.memory_space<vmem>>, vector<8x16xf32>
    %c44 = arith.constant 44 : index
    %c0_41 = arith.constant 0 : index
    %48 = vector.load %arg12[%c44, %c0_41] : memref<56x16xf32, #tpu.memory_space<vmem>>, vector<8x16xf32>
    %49 = tpu.concatenate %29, %30, %31, %32, %33, %34, %35, %36, %37, %38, %39, %40, %41, %42, %43, %44 in 1 : vector<8x16xf32>, vector<8x16xf32>, vector<8x16xf32>, vector<8x16xf32>, vector<8x16xf32>, vector<8x16xf32>, vector<8x16xf32>, vector<8x16xf32>, vector<8x16xf32>, vector<8x16xf32>, vector<8x16xf32>, vector<8x16xf32>, vector<8x16xf32>, vector<8x16xf32>, vector<8x16xf32>, vector<8x16xf32> -> vector<8x256xf32>
    %50 = tpu.concatenate %45, %46, %47, %48 in 1 : vector<8x16xf32>, vector<8x16xf32>, vector<8x16xf32>, vector<8x16xf32> -> vector<8x64xf32>
    %51 = tpu.concatenate %49, %50 in 1 : vector<8x256xf32>, vector<8x64xf32> -> vector<8x320xf32>
    %c0_42 = arith.constant 0 : index
    %c0_43 = arith.constant 0 : index
    %52 = vector.load %arg3[%c0_42, %c0_43] : memref<320x32xf32, #tpu.memory_space<vmem>>, vector<320x32xf32>
    %cst_44 = arith.constant dense<0.000000e+00> : vector<8x32xf32>
    %53 = tpu.matmul %51, %52, %cst_44 {dimension_numbers = #tpu.dot_dimension_numbers<[1], [0], [0], [1], [0, 0, 1, 1], [], []>} : vector<8x320xf32>, vector<320x32xf32>, vector<8x32xf32> -> vector<8x32xf32>
    %c0_45 = arith.constant 0 : index
    %c0_46 = arith.constant 0 : index
    %54 = vector.load %arg4[%c0_45, %c0_46] : memref<1x32xf32, #tpu.memory_space<vmem>>, vector<1x32xf32>
    %55 = vector.broadcast %54 : vector<1x32xf32> to vector<8x32xf32>
    %56 = arith.addf %53, %55 : vector<8x32xf32>
    %cst_47 = arith.constant 0.000000e+00 : f32
    %57 = vector.broadcast %cst_47 : f32 to vector<8x32xf32>
    %58 = arith.maximumf %56, %57 : vector<8x32xf32>
    %c0_48 = arith.constant 0 : index
    %c0_49 = arith.constant 0 : index
    %59 = vector.load %arg13[%c0_48, %c0_49] : memref<8x32xf32, #tpu.memory_space<vmem>>, vector<8x32xf32>
    tpu.vector_store %arg13[%c0_48, %c0_49], %58 {strides = array<i32>} : memref<8x32xf32, #tpu.memory_space<vmem>>, vector<8x32xf32>,
    %c0_50 = arith.constant 0 : index
    %c0_51 = arith.constant 0 : index
    %60 = vector.load %arg13[%c0_50, %c0_51] : memref<8x32xf32, #tpu.memory_space<vmem>>, vector<2x32xf32>
    %c2_52 = arith.constant 2 : index
    %c0_53 = arith.constant 0 : index
    %61 = vector.load %arg13[%c2_52, %c0_53] : memref<8x32xf32, #tpu.memory_space<vmem>>, vector<2x32xf32>
    %62 = arith.maximumf %60, %61 : vector<2x32xf32>
    %c0_54 = arith.constant 0 : index
    %c0_55 = arith.constant 0 : index
    %63 = vector.load %arg14[%c0_54, %c0_55] : memref<4x32xf32, #tpu.memory_space<vmem>>, vector<2x32xf32>
    tpu.vector_store %arg14[%c0_54, %c0_55], %62 {strides = array<i32>} : memref<4x32xf32, #tpu.memory_space<vmem>>, vector<2x32xf32>,
    %c4_56 = arith.constant 4 : index
    %c0_57 = arith.constant 0 : index
    %64 = vector.load %arg13[%c4_56, %c0_57] : memref<8x32xf32, #tpu.memory_space<vmem>>, vector<2x32xf32>
    %c6_58 = arith.constant 6 : index
    %c0_59 = arith.constant 0 : index
    %65 = vector.load %arg13[%c6_58, %c0_59] : memref<8x32xf32, #tpu.memory_space<vmem>>, vector<2x32xf32>
    %66 = arith.maximumf %64, %65 : vector<2x32xf32>
    %c2_60 = arith.constant 2 : index
    %c0_61 = arith.constant 0 : index
    %67 = vector.load %arg14[%c2_60, %c0_61] : memref<4x32xf32, #tpu.memory_space<vmem>>, vector<2x32xf32>
    tpu.vector_store %arg14[%c2_60, %c0_61], %66 {strides = array<i32>} : memref<4x32xf32, #tpu.memory_space<vmem>>, vector<2x32xf32>,
    %c0_62 = arith.constant 0 : index
    %c0_63 = arith.constant 0 : index
    %68 = vector.load %arg14[%c0_62, %c0_63] : memref<4x32xf32, #tpu.memory_space<vmem>>, vector<4x32xf32>
    %c0_64 = arith.constant 0 : index
    %c0_65 = arith.constant 0 : index
    %69 = vector.load %arg5[%c0_64, %c0_65] : memref<32x1024xf32, #tpu.memory_space<vmem>>, vector<32x1024xf32>
    %cst_66 = arith.constant dense<0.000000e+00> : vector<4x1024xf32>
    %70 = tpu.matmul %68, %69, %cst_66 {dimension_numbers = #tpu.dot_dimension_numbers<[1], [0], [0], [1], [0, 0, 1, 1], [], []>} : vector<4x32xf32>, vector<32x1024xf32>, vector<4x1024xf32> -> vector<4x1024xf32>
    %c0_67 = arith.constant 0 : index
    %c0_68 = arith.constant 0 : index
    %71 = vector.load %arg7[%c0_67, %c0_68] : memref<1x1024xf32, #tpu.memory_space<vmem>>, vector<1x1024xf32>
    %72 = vector.broadcast %71 : vector<1x1024xf32> to vector<4x1024xf32>
    %73 = arith.addf %70, %72 : vector<4x1024xf32>
    %c0_69 = arith.constant 0 : index
    %c0_70 = arith.constant 0 : index
    %74 = vector.load %arg15[%c0_69, %c0_70] : memref<4x1024xf32, #tpu.memory_space<vmem>>, vector<4x1024xf32>
    tpu.vector_store %arg15[%c0_69, %c0_70], %73 {strides = array<i32>} : memref<4x1024xf32, #tpu.memory_space<vmem>>, vector<4x1024xf32>,
    %c0_71 = arith.constant 0 : index
    %c0_72 = arith.constant 0 : index
    %75 = vector.load %arg15[%c0_71, %c0_72] : memref<4x1024xf32, #tpu.memory_space<vmem>>, vector<2x1024xf32>
    %76 = vector.extract_strided_slice %75 {offsets = [0, 0], sizes = [2, 256], strides = [1, 1]} : vector<2x1024xf32> to vector<2x256xf32>
    %77 = arith.negf %76 : vector<2x256xf32>
    %78 = math.exp %77 : vector<2x256xf32>
    %cst_73 = arith.constant 1.000000e+00 : f32
    %79 = vector.broadcast %cst_73 : f32 to vector<2x256xf32>
    %80 = arith.addf %79, %78 : vector<2x256xf32>
    %81 = arith.divf %79, %80 : vector<2x256xf32>
    %82 = vector.extract_strided_slice %75 {offsets = [0, 512], sizes = [2, 256], strides = [1, 1]} : vector<2x1024xf32> to vector<2x256xf32>
    %83 = math.tanh %82 : vector<2x256xf32>
    %84 = arith.mulf %81, %83 : vector<2x256xf32>
    %85 = vector.extract_strided_slice %75 {offsets = [0, 768], sizes = [2, 256], strides = [1, 1]} : vector<2x1024xf32> to vector<2x256xf32>
    %86 = arith.negf %85 : vector<2x256xf32>
    %87 = math.exp %86 : vector<2x256xf32>
    %cst_74 = arith.constant 1.000000e+00 : f32
    %88 = vector.broadcast %cst_74 : f32 to vector<2x256xf32>
    %89 = arith.addf %88, %87 : vector<2x256xf32>
    %90 = arith.divf %88, %89 : vector<2x256xf32>
    %91 = math.tanh %84 : vector<2x256xf32>
    %92 = arith.mulf %90, %91 : vector<2x256xf32>
    %c2_75 = arith.constant 2 : index
    %c0_76 = arith.constant 0 : index
    %93 = vector.load %arg15[%c2_75, %c0_76] : memref<4x1024xf32, #tpu.memory_space<vmem>>, vector<2x1024xf32>
    %c0_77 = arith.constant 0 : index
    %c0_78 = arith.constant 0 : index
    %94 = vector.load %arg6[%c0_77, %c0_78] : memref<256x1024xf32, #tpu.memory_space<vmem>>, vector<256x1024xf32>
    %cst_79 = arith.constant dense<0.000000e+00> : vector<2x1024xf32>
    %95 = tpu.matmul %92, %94, %cst_79 {dimension_numbers = #tpu.dot_dimension_numbers<[1], [0], [0], [1], [0, 0, 1, 1], [], []>} : vector<2x256xf32>, vector<256x1024xf32>, vector<2x1024xf32> -> vector<2x1024xf32>
    %96 = arith.addf %93, %95 : vector<2x1024xf32>
    %97 = vector.extract_strided_slice %96 {offsets = [0, 0], sizes = [2, 256], strides = [1, 1]} : vector<2x1024xf32> to vector<2x256xf32>
    %98 = arith.negf %97 : vector<2x256xf32>
    %99 = math.exp %98 : vector<2x256xf32>
    %cst_80 = arith.constant 1.000000e+00 : f32
    %100 = vector.broadcast %cst_80 : f32 to vector<2x256xf32>
    %101 = arith.addf %100, %99 : vector<2x256xf32>
    %102 = arith.divf %100, %101 : vector<2x256xf32>
    %103 = vector.extract_strided_slice %96 {offsets = [0, 512], sizes = [2, 256], strides = [1, 1]} : vector<2x1024xf32> to vector<2x256xf32>
    %104 = math.tanh %103 : vector<2x256xf32>
    %105 = vector.extract_strided_slice %96 {offsets = [0, 256], sizes = [2, 256], strides = [1, 1]} : vector<2x1024xf32> to vector<2x256xf32>
    %106 = arith.negf %105 : vector<2x256xf32>
    %107 = math.exp %106 : vector<2x256xf32>
    %cst_81 = arith.constant 1.000000e+00 : f32
    %108 = vector.broadcast %cst_81 : f32 to vector<2x256xf32>
    %109 = arith.addf %108, %107 : vector<2x256xf32>
    %110 = arith.divf %108, %109 : vector<2x256xf32>
    %111 = arith.mulf %110, %84 : vector<2x256xf32>
    %112 = arith.mulf %102, %104 : vector<2x256xf32>
    %113 = arith.addf %111, %112 : vector<2x256xf32>
    %c0_82 = arith.constant 0 : index
    %c0_83 = arith.constant 0 : index
    %114 = vector.load %arg8[%c0_82, %c0_83] : memref<256x2xf32, #tpu.memory_space<vmem>>, vector<256x2xf32>
    %cst_84 = arith.constant dense<0.000000e+00> : vector<2x2xf32>
    %115 = tpu.matmul %113, %114, %cst_84 {dimension_numbers = #tpu.dot_dimension_numbers<[1], [0], [0], [1], [0, 0, 1, 1], [], []>} : vector<2x256xf32>, vector<256x2xf32>, vector<2x2xf32> -> vector<2x2xf32>
    %c0_85 = arith.constant 0 : index
    %c0_86 = arith.constant 0 : index
    %116 = vector.load %arg9[%c0_85, %c0_86] : memref<1x2xf32, #tpu.memory_space<vmem>>, vector<1x2xf32>
    %117 = vector.broadcast %116 : vector<1x2xf32> to vector<2x2xf32>
    %118 = arith.addf %115, %117 : vector<2x2xf32>
    %c0_87 = arith.constant 0 : index
    %c0_88 = arith.constant 0 : index
    %119 = vector.load %arg10[%c0_87, %c0_88] : memref<2x2xf32, #tpu.memory_space<vmem>>, vector<2x2xf32>
    tpu.vector_store %arg10[%c0_87, %c0_88], %118 {strides = array<i32>} : memref<2x2xf32, #tpu.memory_space<vmem>>, vector<2x2xf32>,
    return
  }
}

</mosaic_0001>

<bundles_post_ra>
// kernel: dnn_forward.1
= control target key start
LH: loop header
LB: loop body
LE: loop exit
PB: predicated region body
PF: predicated region fallthrough
CT: control target
= control target key end

     0   :  { %s4571_s0 = inlined_call_operand.vmem [shape: f32[560,128], index: 0, kind: input, shape index: {}]   ;;  %s4572_s1 = inlined_call_operand.vmem [shape: f32[128,16], index: 1, kind: input, shape index: {}]   ;;  %s4573_s2 = inlined_call_operand.vmem [shape: f32[1,16], index: 2, kind: input, shape index: {}]   ;;  %s4574_s3 = inlined_call_operand.vmem [shape: f32[320,32], index: 3, kind: input, shape index: {}]   ;;  %s4575_s4 = inlined_call_operand.vmem [shape: f32[1,32], index: 4, kind: input, shape index: {}]   ;;  %s4576_s5 = inlined_call_operand.vmem [shape: f32[32,1024], index: 5, kind: input, shape index: {}]   ;;  %s4577_s6 = inlined_call_operand.vmem [shape: f32[256,1024], index: 6, kind: input, shape index: {}]   ;;  %s4578_s7 = inlined_call_operand.vmem [shape: f32[1,1024], index: 7, kind: input, shape index: {}]   ;;  %s4579_s8 = inlined_call_operand.vmem [shape: f32[256,2], index: 8, kind: input, shape index: {}]   ;;  %s4580_s9 = inlined_call_operand.vmem [shape: f32[1,2], index: 9, kind: input, shape index: {}]   ;;  %s4581_s10 = inlined_call_operand.hbm [shape: f32[2,2], index: 10, kind: output, shape index: {}]  }
   0x1   :  { %v106_v0 = vld [vmem:[%s4572_s1] sm:$0xff]  ;;  %v107_v1 = vld [vmem:[%s4572_s1 + $0x8] sm:$0xff]  ;;  %v108_v2 = vld [vmem:[%s4572_s1 + $0x10] sm:$0xff] }
   0x2   :  { %v2527_v3 = vpack.c.bf16 %v107_v1, %v106_v0  ;;  %v109_v4 = vld [vmem:[%s4572_s1 + $0x18] sm:$0xff]  ;;  %v110_v6 = vld [vmem:[%s4572_s1 + $0x20] sm:$0xff]  ;;  %v111_v7 = vld [vmem:[%s4572_s1 + $0x28] sm:$0xff] }
   0x3   :  { %v2531_v5 = vpack.c.bf16 %v109_v4, %v108_v2  ;;  %v2535_v8 = vpack.c.bf16 %v111_v7, %v110_v6  ;;  %v36_v9 = vld [vmem:[%s4571_s0] sm:$0xff]  ;;  %v112_v10 = vld [vmem:[%s4572_s1 + $0x30] sm:$0xff]  ;;  %v113_v11 = vld [vmem:[%s4572_s1 + $0x38] sm:$0xff] }
   0x4   :  { %2528 = vmatprep.subr.bf16.mxu0 %v2527_v3  ;;  %2403 = vmatprep.mubr.f32.mxu0 %v36_v9  ;;  %v2539_v12 = vpack.c.bf16 %v113_v11, %v112_v10  ;;  %v114_v13 = vld [vmem:[%s4572_s1 + $0x40] sm:$0xff]  ;;  %v115_v14 = vld [vmem:[%s4572_s1 + $0x48] sm:$0xff]  ;;  %v116_v16 = vld [vmem:[%s4572_s1 + $0x50] sm:$0xff] }
   0x5   :  { %2530 = vmatpush3.bf16.msra.mxu0 %v2527_v3  ;;  %v2543_v15 = vpack.c.bf16 %v115_v14, %v114_v13  ;;  %v117_v17 = vld [vmem:[%s4572_s1 + $0x58] sm:$0xff]  ;;  %v118_v19 = vld [vmem:[%s4572_s1 + $0x60] sm:$0xff]  ;;  %v119_v20 = vld [vmem:[%s4572_s1 + $0x68] sm:$0xff] }
   0x6   :  { %2532 = vmatprep.subr.bf16.mxu0 %v2531_v5  ;;  %v2547_v18 = vpack.c.bf16 %v117_v17, %v116_v16  ;;  %v2551_v21 = vpack.c.bf16 %v119_v20, %v118_v19  ;;  %v120_v22 = vld [vmem:[%s4572_s1 + $0x70] sm:$0xff]  ;;  %v121_v23 = vld [vmem:[%s4572_s1 + $0x78] sm:$0xff] }
   0x7   :  { %v2555_v24 = vpack.c.bf16 %v121_v23, %v120_v22 }
   0x9   :  { %2534 = vmatpush3.bf16.msra.mxu0 %v2531_v5 }
   0xa   :  { %2536 = vmatprep.subr.bf16.mxu0 %v2535_v8 }
   0xd   :  { %2538 = vmatpush3.bf16.msra.mxu0 %v2535_v8 }
   0xe   :  { %2540 = vmatprep.subr.bf16.mxu0 %v2539_v12 }
  0x11   :  { %2542 = vmatpush3.bf16.msra.mxu0 %v2539_v12 }
  0x12   :  { %2544 = vmatprep.subr.bf16.mxu0 %v2543_v15 }
  0x15   :  { %2546 = vmatpush3.bf16.msra.mxu0 %v2543_v15 }
  0x16   :  { %2548 = vmatprep.subr.bf16.mxu0 %v2547_v18 }
  0x19   :  { %2550 = vmatpush3.bf16.msra.mxu0 %v2547_v18 }
  0x1a   :  { %2552 = vmatprep.subr.bf16.mxu0 %v2551_v21 }
  0x1b   :  { %15 = vsyncpa [#allocation8], 0  ;;  %v37_v25 = vld [vmem:[%s4571_s0 + $0x8] sm:$0xff]  ;;  %v38_v26 = vld [vmem:[%s4571_s0 + $0x10] sm:$0xff]  ;;  %vm537_vm0 = vcmask 130048   ;;  %s3015_s25 = smov 64  }
  0x1c   :  { %v39_v27 = vld [vmem:[%s4571_s0 + $0x18] sm:$0xff]  ;;  %v40_v28 = vld [vmem:[%s4571_s0 + $0x20] sm:$0xff]  ;;  %v41_v29 = vld [vmem:[%s4571_s0 + $0x28] sm:$0xff]  ;;  %s3016_s30 = smov 32   ;;  %s3018_s18 = smov 16   ;;  %vm846_vm1 = vcmask 261120  }
  0x1d   :  { %2554 = vmatpush3.bf16.msra.mxu0 %v2551_v21  ;;  %v42_v30 = vld [vmem:[%s4571_s0 + $0x30] sm:$0xff]  ;;  %v43_v31 = vld [vmem:[%s4571_s0 + $0x38] sm:$0xff]  ;;  %v44_v32 = vld [vmem:[%s4571_s0 + $0x40] sm:$0xff]  ;;  %s3020_s19 = smov 96   ;;  %s3021_s20 = smov 80   ;;  %vm848_vm2 = vcmask 392192  }
  0x1e   :  { %2556 = vmatprep.subr.bf16.mxu0 %v2555_v24  ;;  %v45_v33 = vld [vmem:[%s4571_s0 + $0x48] sm:$0xff]  ;;  %v46_v34 = vld [vmem:[%s4571_s0 + $0x50] sm:$0xff]  ;;  %v47_v35 = vld [vmem:[%s4571_s0 + $0x58] sm:$0xff]  ;;  %s3022_s21 = smov 112   ;;  %vm850_vm3 = vcmask 523264   ;;  %vm852_vm4 = vcmask 654336  }
  0x1f   :  { %v48_v36 = vld [vmem:[%s4571_s0 + $0x60] sm:$0xff]  ;;  %v49_v37 = vld [vmem:[%s4571_s0 + $0x68] sm:$0xff]  ;;  %v50_v38 = vld [vmem:[%s4571_s0 + $0x70] sm:$0xff]  ;;  %vm854_vm5 = vcmask 785408   ;;  %vm856_vm6 = vcmask 916480   ;;  %vm3023_vm7 = vmmov 0  }
  0x20   :  { %v51_v39 = vld [vmem:[%s4571_s0 + $0x78] sm:$0xff]  ;;  %v52_v40 = vld [vmem:[%s4571_s0 + $0x80] sm:$0xff]  ;;  %v53_v41 = vld [vmem:[%s4571_s0 + $0x88] sm:$0xff]  ;;  %vm1075_vm8 = vcmask 254976   ;;  %s3025_s24 = smov [#allocation7]   ;;  %vm2178_vm9 = vcmask 9216  }
  0x21   :  { %2558 = vmatpush3.bf16.msra.mxu0 %v2555_v24  ;;  %v54_v42 = vld [vmem:[%s4571_s0 + $0x90] sm:$0xff]  ;;  %v55_v43 = vld [vmem:[%s4571_s0 + $0x98] sm:$0xff]  ;;  %v56_v44 = vld [vmem:[%s4571_s0 + $0xa0] sm:$0xff] }
  0x22   :  { %v57_v45 = vld [vmem:[%s4571_s0 + $0xa8] sm:$0xff]  ;;  %v58_v46 = vld [vmem:[%s4571_s0 + $0xb0] sm:$0xff]  ;;  %v59_v47 = vld [vmem:[%s4571_s0 + $0xb8] sm:$0xff] }
  0x23   :  { %v60_v48 = vld [vmem:[%s4571_s0 + $0xc0] sm:$0xff]  ;;  %v61_v49 = vld [vmem:[%s4571_s0 + $0xc8] sm:$0xff]  ;;  %v62_v50 = vld [vmem:[%s4571_s0 + $0xd0] sm:$0xff] }
  0x24   :  { %2404 = vmatmul.mubr.f32.vlgmr.msra.gmra.mrb[0].mxu0 %v37_v25  ;;  %v63_v51 = vld [vmem:[%s4571_s0 + $0xd8] sm:$0xff]  ;;  %v64_v52 = vld [vmem:[%s4571_s0 + $0xe0] sm:$0xff]  ;;  %v65_v53 = vld [vmem:[%s4571_s0 + $0xe8] sm:$0xff] }
  0x25   :  { %2406 = vmatprep.mubr.f32.mxu0 %v38_v26  ;;  %v66_v54 = vld [vmem:[%s4571_s0 + $0xf0] sm:$0xff]  ;;  %v67_v55 = vld [vmem:[%s4571_s0 + $0xf8] sm:$0xff]  ;;  %v68_v56 = vld [vmem:[%s4571_s0 + $0x100] sm:$0xff] }
  0x26   :  { %v69_v57 = vld [vmem:[%s4571_s0 + $0x108] sm:$0xff]  ;;  %v70_v58 = vld [vmem:[%s4571_s0 + $0x110] sm:$0xff]  ;;  %v71_v59 = vld [vmem:[%s4571_s0 + $0x118] sm:$0xff] }
  0x27   :  { %v72_v60 = vld [vmem:[%s4571_s0 + $0x120] sm:$0xff]  ;;  %v73_v61 = vld [vmem:[%s4571_s0 + $0x128] sm:$0xff]  ;;  %v74_v62 = vld [vmem:[%s4571_s0 + $0x130] sm:$0xff] }
  0x28   :  { %2407 = vmatmul.mubr.f32.gmra.mrb[2].mxu0 %v39_v27  ;;  %v75_v63 = vld [vmem:[%s4571_s0 + $0x138] sm:$0xff]  ;;  %v76_v0 = vld [vmem:[%s4571_s0 + $0x140] sm:$0xff]  ;;  %v77_v1 = vld [vmem:[%s4571_s0 + $0x148] sm:$0xff] }
  0x29   :  { %2409 = vmatprep.mubr.f32.mxu0 %v40_v28  ;;  %v78_v2 = vld [vmem:[%s4571_s0 + $0x150] sm:$0xff]  ;;  %v79_v3 = vld [vmem:[%s4571_s0 + $0x158] sm:$0xff]  ;;  %v80_v4 = vld [vmem:[%s4571_s0 + $0x160] sm:$0xff] }
  0x2a   :  { %v81_v5 = vld [vmem:[%s4571_s0 + $0x168] sm:$0xff]  ;;  %v82_v6 = vld [vmem:[%s4571_s0 + $0x170] sm:$0xff]  ;;  %v83_v7 = vld [vmem:[%s4571_s0 + $0x178] sm:$0xff] }
  0x2b   :  { %v84_v8 = vld [vmem:[%s4571_s0 + $0x180] sm:$0xff]  ;;  %v85_v9 = vld [vmem:[%s4571_s0 + $0x188] sm:$0xff]  ;;  %v86_v10 = vld [vmem:[%s4571_s0 + $0x190] sm:$0xff] }
  0x2c   :  { %2410 = vmatmul.mubr.f32.gmra.mrb[4].mxu0 %v41_v29  ;;  %v87_v11 = vld [vmem:[%s4571_s0 + $0x198] sm:$0xff]  ;;  %v88_v12 = vld [vmem:[%s4571_s0 + $0x1a0] sm:$0xff]  ;;  %v89_v13 = vld [vmem:[%s4571_s0 + $0x1a8] sm:$0xff] }
  0x2d   :  { %2412 = vmatprep.mubr.f32.mxu0 %v42_v30  ;;  %v90_v14 = vld [vmem:[%s4571_s0 + $0x1b0] sm:$0xff]  ;;  %v91_v15 = vld [vmem:[%s4571_s0 + $0x1b8] sm:$0xff]  ;;  %v92_v16 = vld [vmem:[%s4571_s0 + $0x1c0] sm:$0xff] }
  0x2e   :  { %v93_v17 = vld [vmem:[%s4571_s0 + $0x1c8] sm:$0xff]  ;;  %v94_v18 = vld [vmem:[%s4571_s0 + $0x1d0] sm:$0xff]  ;;  %v95_v19 = vld [vmem:[%s4571_s0 + $0x1d8] sm:$0xff] }
  0x2f   :  { %v96_v20 = vld [vmem:[%s4571_s0 + $0x1e0] sm:$0xff]  ;;  %v97_v21 = vld [vmem:[%s4571_s0 + $0x1e8] sm:$0xff]  ;;  %v98_v22 = vld [vmem:[%s4571_s0 + $0x1f0] sm:$0xff] }
  0x30   :  { %2413 = vmatmul.mubr.f32.gmra.mrb[6].mxu0 %v43_v31  ;;  %v99_v23 = vld [vmem:[%s4571_s0 + $0x1f8] sm:$0xff]  ;;  %v100_v24 = vld [vmem:[%s4571_s0 + $0x200] sm:$0xff]  ;;  %v101_v25 = vld [vmem:[%s4571_s0 + $0x208] sm:$0xff] }
  0x31   :  { %2415 = vmatprep.mubr.f32.mxu0 %v44_v32  ;;  %v102_v26 = vld [vmem:[%s4571_s0 + $0x210] sm:$0xff]  ;;  %v103_v27 = vld [vmem:[%s4571_s0 + $0x218] sm:$0xff]  ;;  %v104_v28 = vld [vmem:[%s4571_s0 + $0x220] sm:$0xff] }
  0x32   :  { %v105_v29 = vld [vmem:[%s4571_s0 + $0x228] sm:$0xff]  ;;  %s3017_s0 = smov 48  }
  0x34   :  { %2416 = vmatmul.mubr.f32.gmra.mrb[8].mxu0 %v45_v33 }
  0x35   :  { %2418 = vmatprep.mubr.f32.mxu0 %v46_v34 }
  0x38   :  { %2419 = vmatmul.mubr.f32.gmra.mrb[10].mxu0 %v47_v35 }
  0x39   :  { %2421 = vmatprep.mubr.f32.mxu0 %v48_v36 }
  0x3c   :  { %2422 = vmatmul.mubr.f32.gmra.mrb[12].mxu0 %v49_v37 }
  0x3d   :  { %2424 = vmatprep.mubr.f32.mxu0 %v50_v38 }
  0x40   :  { %2425 = vmatmul.mubr.f32.gmra.mrb[14].mxu0 %v51_v39 }
  0x41   :  { %2427 = vmatprep.mubr.f32.mxu0 %v52_v40 }
  0x44   :  { %2428 = vmatmul.mubr.f32.gmra.mrb[16].mxu0 %v53_v41 }
  0x45   :  { %2430 = vmatprep.mubr.f32.mxu0 %v54_v42 }
  0x48   :  { %2431 = vmatmul.mubr.f32.gmra.mrb[18].mxu0 %v55_v43 }
  0x49   :  { %2433 = vmatprep.mubr.f32.mxu0 %v56_v44 }
  0x4c   :  { %2434 = vmatmul.mubr.f32.gmra.mrb[20].mxu0 %v57_v45 }
  0x4d   :  { %2436 = vmatprep.mubr.f32.mxu0 %v58_v46 }
  0x50   :  { %2437 = vmatmul.mubr.f32.gmra.mrb[22].mxu0 %v59_v47 }
  0x51   :  { %2439 = vmatprep.mubr.f32.mxu0 %v60_v48 }
  0x54   :  { %2440 = vmatmul.mubr.f32.gmra.mrb[24].mxu0 %v61_v49 }
  0x55   :  { %2442 = vmatprep.mubr.f32.mxu0 %v62_v50 }
  0x58   :  { %2443 = vmatmul.mubr.f32.gmra.mrb[26].mxu0 %v63_v51 }
  0x59   :  { %2445 = vmatprep.mubr.f32.mxu0 %v64_v52 }
  0x5c   :  { %2446 = vmatmul.mubr.f32.gmra.mrb[28].mxu0 %v65_v53 }
  0x5d   :  { %2448 = vmatprep.mubr.f32.mxu0 %v66_v54  ;;  %v896_v54 = vld [vmem:[%s4574_s3 + $0x80] sm:$0xff] }
  0x60   :  { %2449 = vmatmul.mubr.f32.gmra.mrb[30].mxu0 %v67_v55  ;;  %v897_v55 = vld [vmem:[%s4574_s3 + $0x88] sm:$0xff] }
  0x61   :  { %2451 = vmatprep.mubr.f32.mxu0 %v68_v56  ;;  %v880_v56 = vld [vmem:[%s4574_s3] sm:$0xff] }
  0x64   :  { %2452 = vmatmul.mubr.f32.gmra.mrb[32].mxu0 %v69_v57  ;;  %v2559_v57 = vpack.c.bf16 %v897_v55, %v896_v54 }
  0x65   :  { %2454 = vmatprep.mubr.f32.mxu0 %v70_v58  ;;  %v881_v58 = vld [vmem:[%s4574_s3 + $0x8] sm:$0xff] }
  0x66   :  { %2560 = vmatprep.subr.bf16.mxu1 %v2559_v57 }
  0x68   :  { %2455 = vmatmul.mubr.f32.gmra.mrb[34].mxu0 %v71_v59  ;;  %v898_v59 = vld [vmem:[%s4574_s3 + $0x90] sm:$0xff] }
  0x69   :  { %2457 = vmatprep.mubr.f32.mxu0 %v72_v60  ;;  %v899_v60 = vld [vmem:[%s4574_s3 + $0x98] sm:$0xff] }
  0x6c   :  { %2458 = vmatmul.mubr.f32.gmra.mrb[36].mxu0 %v73_v61 }
  0x6d   :  { %2460 = vmatprep.mubr.f32.mxu0 %v74_v62  ;;  %v2561_v62 = vpack.c.bf16 %v881_v58, %v880_v56 }
  0x6f   :  { %2562 = vmatpush3.bf16.msra.mxu1 %v2561_v62 }
  0x70   :  { %2461 = vmatmul.mubr.f32.gmra.mrb[38].mxu0 %v75_v63  ;;  %v2563_v63 = vpack.c.bf16 %v899_v60, %v898_v59 }
  0x71   :  { %2463 = vmatprep.mubr.f32.mxu0 %v76_v0  ;;  %v882_v0 = vld [vmem:[%s4574_s3 + $0x10] sm:$0xff] }
  0x72   :  { %2564 = vmatprep.subr.bf16.mxu1 %v2563_v63 }
  0x74   :  { %2464 = vmatmul.mubr.f32.gmra.mrb[40].mxu0 %v77_v1  ;;  %v883_v1 = vld [vmem:[%s4574_s3 + $0x18] sm:$0xff] }
  0x75   :  { %2466 = vmatprep.mubr.f32.mxu0 %v78_v2 }
  0x78   :  { %2467 = vmatmul.mubr.f32.gmra.mrb[42].mxu0 %v79_v3  ;;  %v900_v3 = vld [vmem:[%s4574_s3 + $0xa0] sm:$0xff] }
  0x79   :  { %2469 = vmatprep.mubr.f32.mxu0 %v80_v4  ;;  %v901_v4 = vld [vmem:[%s4574_s3 + $0xa8] sm:$0xff] }
  0x7c   :  { %2470 = vmatmul.mubr.f32.gmra.mrb[44].mxu0 %v81_v5  ;;  %v2565_v5 = vpack.c.bf16 %v883_v1, %v882_v0 }
  0x7d   :  { %2472 = vmatprep.mubr.f32.mxu0 %v82_v6  ;;  %v2567_v6 = vpack.c.bf16 %v901_v4, %v900_v3 }
  0x7e   :  { %2566 = vmatpush3.bf16.msra.mxu1 %v2565_v5 }
  0x7f   :  { %2568 = vmatprep.subr.bf16.mxu1 %v2567_v6 }
  0x80   :  { %2473 = vmatmul.mubr.f32.gmra.mrb[46].mxu0 %v83_v7  ;;  %v884_v7 = vld [vmem:[%s4574_s3 + $0x20] sm:$0xff] }
  0x81   :  { %2475 = vmatprep.mubr.f32.mxu0 %v84_v8  ;;  %v885_v8 = vld [vmem:[%s4574_s3 + $0x28] sm:$0xff] }
  0x84   :  { %2476 = vmatmul.mubr.f32.gmra.mrb[48].mxu0 %v85_v9 }
  0x85   :  { %2478 = vmatprep.mubr.f32.mxu0 %v86_v10  ;;  %v902_v10 = vld [vmem:[%s4574_s3 + $0xb0] sm:$0xff] }
  0x88   :  { %2479 = vmatmul.mubr.f32.gmra.mrb[50].mxu0 %v87_v11  ;;  %v903_v11 = vld [vmem:[%s4574_s3 + $0xb8] sm:$0xff] }
  0x89   :  { %2481 = vmatprep.mubr.f32.mxu0 %v88_v12 }
  0x8c   :  { %2482 = vmatmul.mubr.f32.gmra.mrb[52].mxu0 %v89_v13  ;;  %v2569_v13 = vpack.c.bf16 %v885_v8, %v884_v7 }
  0x8d   :  { %2484 = vmatprep.mubr.f32.mxu0 %v90_v14  ;;  %v2571_v14 = vpack.c.bf16 %v903_v11, %v902_v10 }
  0x8e   :  { %2570 = vmatpush3.bf16.msra.mxu1 %v2569_v13 }
  0x8f   :  { %2572 = vmatprep.subr.bf16.mxu1 %v2571_v14 }
  0x90   :  { %2485 = vmatmul.mubr.f32.gmra.mrb[54].mxu0 %v91_v15 }
  0x91   :  { %2487 = vmatprep.mubr.f32.mxu0 %v92_v16 }
  0x94   :  { %2488 = vmatmul.mubr.f32.gmra.mrb[56].mxu0 %v93_v17 }
  0x95   :  { %2490 = vmatprep.mubr.f32.mxu0 %v94_v18 }
  0x98   :  { %2491 = vmatmul.mubr.f32.gmra.mrb[58].mxu0 %v95_v19 }
  0x99   :  { %2493 = vmatprep.mubr.f32.mxu0 %v96_v20 }
  0x9c   :  { %2494 = vmatmul.mubr.f32.gmra.mrb[60].mxu0 %v97_v21 }
  0x9d   :  { %2496 = vmatprep.mubr.f32.mxu0 %v98_v22 }
  0xa0   :  { %2497 = vmatmul.mubr.f32.gmra.mrb[62].mxu0 %v99_v23 }
  0xa1   :  { %2499 = vmatprep.mubr.f32.mxu0 %v100_v24 }
  0xa4   :  { %2500 = vmatmul.mubr.f32.gmra.mrb[64].mxu0 %v101_v25 }
  0xa5   :  { %2502 = vmatprep.mubr.f32.mxu0 %v102_v26 }
  0xa8   :  { %2503 = vmatmul.mubr.f32.gmra.mrb[66].mxu0 %v103_v27 }
  0xa9   :  { %2505 = vmatprep.mubr.f32.mxu0 %v104_v28 }
  0xac   :  { %2506 = vmatmul.mubr.f32.gmra.mrb[68].mxu0 %v105_v29 }
  0xf7   :  { %v2405_v30 = vpop.f32.mrb[0].mxu0 }
  0xf8   :  { %539 = vst.msk [vmem:[#allocation2 + $0x8] sm:$0xff] %vm537_vm0, %v2405_v30  ;;  %v188_v31 = vpop.f32.mrb[1].mxu0 }
  0xf9   :  { %538 = vst.msk [vmem:[#allocation2] sm:$0xff] %vm537_vm0, %v188_v31 }
  0xfb   :  { %v2408_v32 = vpop.f32.mrb[2].mxu0 }
  0xfc   :  { %541 = vst.msk [vmem:[#allocation2 + $0x18] sm:$0xff] %vm537_vm0, %v2408_v32  ;;  %v198_v33 = vpop.f32.mrb[3].mxu0 }
  0xfd   :  { %540 = vst.msk [vmem:[#allocation2 + $0x10] sm:$0xff] %vm537_vm0, %v198_v33 }
  0xff   :  { %v2411_v34 = vpop.f32.mrb[4].mxu0  ;;  %v609_v59 = vld [vmem:[#allocation2 + $0x8] sm:$0xff] }
 0x100   :  { %543 = vst.msk [vmem:[#allocation2 + $0x28] sm:$0xff] %vm537_vm0, %v2411_v34  ;;  %v208_v35 = vpop.f32.mrb[5].mxu0 }
 0x101   :  { %542 = vst.msk [vmem:[#allocation2 + $0x20] sm:$0xff] %vm537_vm0, %v208_v35 }
 0x103   :  { %v2414_v36 = vpop.f32.mrb[6].mxu0  ;;  %v611_v4 = vld [vmem:[#allocation2 + $0x18] sm:$0xff] }
 0x104   :  { %545 = vst.msk [vmem:[#allocation2 + $0x38] sm:$0xff] %vm537_vm0, %v2414_v36  ;;  %v218_v37 = vpop.f32.mrb[7].mxu0  ;;  %v610_v55 = vld [vmem:[#allocation2 + $0x10] sm:$0xff] }
 0x105   :  { %544 = vst.msk [vmem:[#allocation2 + $0x30] sm:$0xff] %vm537_vm0, %v218_v37 }
 0x107   :  { %v2417_v38 = vpop.f32.mrb[8].mxu0 }
 0x108   :  { %547 = vst.msk [vmem:[#allocation2 + $0x48] sm:$0xff] %vm537_vm0, %v2417_v38  ;;  %v228_v39 = vpop.f32.mrb[9].mxu0  ;;  %v612_v5 = vld [vmem:[#allocation2 + $0x20] sm:$0xff] }
 0x109   :  { %546 = vst.msk [vmem:[#allocation2 + $0x40] sm:$0xff] %vm537_vm0, %v228_v39 }
 0x10b   :  { %v2420_v40 = vpop.f32.mrb[10].mxu0 }
 0x10c   :  { %549 = vst.msk [vmem:[#allocation2 + $0x58] sm:$0xff] %vm537_vm0, %v2420_v40  ;;  %v238_v41 = vpop.f32.mrb[11].mxu0 }
 0x10d   :  { %548 = vst.msk [vmem:[#allocation2 + $0x50] sm:$0xff] %vm537_vm0, %v238_v41 }
 0x10f   :  { %v2423_v42 = vpop.f32.mrb[12].mxu0 }
 0x110   :  { %551 = vst.msk [vmem:[#allocation2 + $0x68] sm:$0xff] %vm537_vm0, %v2423_v42  ;;  %v248_v43 = vpop.f32.mrb[13].mxu0 }
 0x111   :  { %550 = vst.msk [vmem:[#allocation2 + $0x60] sm:$0xff] %vm537_vm0, %v248_v43 }
 0x113   :  { %v2426_v44 = vpop.f32.mrb[14].mxu0  ;;  %v619_v1 = vld [vmem:[#allocation2 + $0x58] sm:$0xff] }
 0x114   :  { %553 = vst.msk [vmem:[#allocation2 + $0x78] sm:$0xff] %vm537_vm0, %v2426_v44  ;;  %v258_v45 = vpop.f32.mrb[15].mxu0  ;;  %v618_v6 = vld [vmem:[#allocation2 + $0x50] sm:$0xff] }
 0x115   :  { %552 = vst.msk [vmem:[#allocation2 + $0x70] sm:$0xff] %vm537_vm0, %v258_v45  ;;  %v615_v45 = vld [vmem:[#allocation2 + $0x38] sm:$0xff] }
 0x117   :  { %v2429_v46 = vpop.f32.mrb[16].mxu0  ;;  %v621_v10 = vld [vmem:[#allocation2 + $0x68] sm:$0xff] }
 0x118   :  { %555 = vst.msk [vmem:[#allocation2 + $0x88] sm:$0xff] %vm537_vm0, %v2429_v46  ;;  %v268_v47 = vpop.f32.mrb[17].mxu0  ;;  %v608_v46 = vld [vmem:[#allocation2] sm:$0xff] }
 0x119   :  { %554 = vst.msk [vmem:[#allocation2 + $0x80] sm:$0xff] %vm537_vm0, %v268_v47 }
 0x11b   :  { %v2432_v48 = vpop.f32.mrb[18].mxu0 }
 0x11c   :  { %557 = vst.msk [vmem:[#allocation2 + $0x98] sm:$0xff] %vm537_vm0, %v2432_v48  ;;  %v278_v49 = vpop.f32.mrb[19].mxu0  ;;  %v629_v47 = vld [vmem:[#allocation2 + $0x70] sm:$0xff] }
 0x11d   :  { %556 = vst.msk [vmem:[#allocation2 + $0x90] sm:$0xff] %vm537_vm0, %v278_v49  ;;  %v622_v49 = vmax.f32 %v608_v46, %v615_v45 }
 0x11f   :  { %v2435_v50 = vpop.f32.mrb[20].mxu0  ;;  %v636_v54 = vmax.f32 %v622_v49, %v629_v47 }
 0x120   :  { %559 = vst.msk [vmem:[#allocation2 + $0xa8] sm:$0xff] %vm537_vm0, %v2435_v50  ;;  %v288_v51 = vpop.f32.mrb[21].mxu0  ;;  %v631_v56 = vld [vmem:[#allocation2 + $0x80] sm:$0xff] }
 0x121   :  { %558 = vst.msk [vmem:[#allocation2 + $0xa0] sm:$0xff] %vm537_vm0, %v288_v51  ;;  %v617_v51 = vld [vmem:[#allocation2 + $0x48] sm:$0xff] }
 0x122   :  { %v624_v60 = vmax.f32 %v610_v55, %v617_v51 }
 0x123   :  { %v2438_v52 = vpop.f32.mrb[22].mxu0 }
 0x124   :  { %561 = vst.msk [vmem:[#allocation2 + $0xb8] sm:$0xff] %vm537_vm0, %v2438_v52  ;;  %v298_v53 = vpop.f32.mrb[23].mxu0  ;;  %v638_v7 = vmax.f32 %v624_v60, %v631_v56 }
 0x125   :  { %560 = vst.msk [vmem:[#allocation2 + $0xb0] sm:$0xff] %vm537_vm0, %v298_v53  ;;  %v616_v53 = vld [vmem:[#allocation2 + $0x40] sm:$0xff] }
 0x126   :  { %v623_v0 = vmax.f32 %v609_v59, %v616_v53 }
 0x127   :  { %v2441_v61 = vpop.f32.mrb[24].mxu0  ;;  %v643_v52 = vld [vmem:[#allocation2 + $0xa8] sm:$0xff] }
 0x128   :  { %563 = vst.msk [vmem:[#allocation2 + $0xc8] sm:$0xff] %vm537_vm0, %v2441_v61  ;;  %v308_v2 = vpop.f32.mrb[25].mxu0  ;;  %v630_v61 = vld [vmem:[#allocation2 + $0x78] sm:$0xff]  ;;  %v650_v62 = vmax.f32 %v636_v54, %v643_v52 }
 0x129   :  { %562 = vst.msk [vmem:[#allocation2 + $0xc0] sm:$0xff] %vm537_vm0, %v308_v2  ;;  %v637_v11 = vmax.f32 %v623_v0, %v630_v61 }
 0x12b   :  { %v2444_v9 = vpop.f32.mrb[26].mxu0  ;;  %v645_v2 = vld [vmem:[#allocation2 + $0xb8] sm:$0xff] }
 0x12c   :  { %565 = vst.msk [vmem:[#allocation2 + $0xd8] sm:$0xff] %vm537_vm0, %v2444_v9  ;;  %v318_v12 = vpop.f32.mrb[27].mxu0  ;;  %v644_v8 = vld [vmem:[#allocation2 + $0xb0] sm:$0xff] }
 0x12d   :  { %564 = vst.msk [vmem:[#allocation2 + $0xd0] sm:$0xff] %vm537_vm0, %v318_v12  ;;  %v633_v12 = vld [vmem:[#allocation2 + $0x90] sm:$0xff] }
 0x12f   :  { %v2447_v15 = vpop.f32.mrb[28].mxu0 }
 0x130   :  { %567 = vst.msk [vmem:[#allocation2 + $0xe8] sm:$0xff] %vm537_vm0, %v2447_v15  ;;  %v328_v16 = vpop.f32.mrb[29].mxu0 }
 0x131   :  { %566 = vst.msk [vmem:[#allocation2 + $0xe0] sm:$0xff] %vm537_vm0, %v328_v16  ;;  %v626_v16 = vmax.f32 %v612_v5, %v619_v1 }
 0x133   :  { %v2450_v17 = vpop.f32.mrb[30].mxu0  ;;  %v649_v45 = vld [vmem:[#allocation2 + $0xd8] sm:$0xff] }
 0x134   :  { %569 = vst.msk [vmem:[#allocation2 + $0xf8] sm:$0xff] %vm537_vm0, %v2450_v17  ;;  %v338_v18 = vpop.f32.mrb[31].mxu0  ;;  %v620_v17 = vld [vmem:[#allocation2 + $0x60] sm:$0xff]  ;;  %v648_v53 = vld [vmem:[#allocation2 + $0xd0] sm:$0xff] }
 0x135   :  { %568 = vst.msk [vmem:[#allocation2 + $0xf0] sm:$0xff] %vm537_vm0, %v338_v18  ;;  %v632_v18 = vld [vmem:[#allocation2 + $0x88] sm:$0xff] }
 0x137   :  { %v2453_v19 = vpop.f32.mrb[32].mxu0 }
 0x138   :  { %571 = vst.msk [vmem:[#allocation2 + $0x108] sm:$0xff] %vm537_vm0, %v2453_v19  ;;  %v348_v20 = vpop.f32.mrb[33].mxu0  ;;  %v657_v57 = vld [vmem:[#allocation2 + $0xe0] sm:$0xff]  ;;  %v652_v19 = vmax.f32 %v638_v7, %v645_v2 }
 0x139   :  { %570 = vst.msk [vmem:[#allocation2 + $0x100] sm:$0xff] %vm537_vm0, %v348_v20  ;;  %v664_v9 = vmax.f32 %v650_v62, %v657_v57  ;;  %v658_v20 = vld [vmem:[#allocation2 + $0xe8] sm:$0xff]  ;;  %v3449_v57 = vld [vmem:[%s4573_s2] ss:$0 sm:$0xff]  ;;  %s2186_s2 = sshll.u32 %s3025_s24, 4  ;;  %s2187_s2 = int_to_ptr.vmem [resolvable:$true] %s2186_s2 }
 0x13a   :  { %p2996_p1 = scmp.lt.s32.totalorder %s2187_s2, %s2187_s2 }
 0x13b   :  { %v2456_v21 = vpop.f32.mrb[34].mxu0  ;;  %v660_v46 = vld [vmem:[#allocation2 + $0xf8] sm:$0xff] }
 0x13c   :  { %573 = vst.msk [vmem:[#allocation2 + $0x118] sm:$0xff] %vm537_vm0, %v2456_v21  ;;  %v358_v22 = vpop.f32.mrb[35].mxu0  ;;  %v659_v13 = vld [vmem:[#allocation2 + $0xf0] sm:$0xff] }
 0x13d   :  { %572 = vst.msk [vmem:[#allocation2 + $0x110] sm:$0xff] %vm537_vm0, %v358_v22 }
 0x13f   :  { %v2459_v23 = vpop.f32.mrb[36].mxu0 }
 0x140   :  { %575 = vst.msk [vmem:[#allocation2 + $0x128] sm:$0xff] %vm537_vm0, %v2459_v23  ;;  %v368_v24 = vpop.f32.mrb[37].mxu0  ;;  %v614_v23 = vld [vmem:[#allocation2 + $0x30] sm:$0xff] }
 0x141   :  { %574 = vst.msk [vmem:[#allocation2 + $0x120] sm:$0xff] %vm537_vm0, %v368_v24  ;;  %v625_v24 = vmax.f32 %v611_v4, %v618_v6 }
 0x143   :  { %v2462_v25 = vpop.f32.mrb[38].mxu0  ;;  %v671_v3 = vld [vmem:[#allocation2 + $0x118] sm:$0xff] }
 0x144   :  { %577 = vst.msk [vmem:[#allocation2 + $0x138] sm:$0xff] %vm537_vm0, %v2462_v25  ;;  %v378_v26 = vpop.f32.mrb[39].mxu0  ;;  %v678_v21 = vmax.f32 %v664_v9, %v671_v3  ;;  %v651_v25 = vmax.f32 %v637_v11, %v644_v8  ;;  %v663_v60 = vld [vmem:[#allocation2 + $0x110] sm:$0xff]  ;;  %v662_v9 = vld [vmem:[#allocation2 + $0x108] sm:$0xff] }
 0x145   :  { %576 = vst.msk [vmem:[#allocation2 + $0x130] sm:$0xff] %vm537_vm0, %v378_v26  ;;  %v647_v26 = vld [vmem:[#allocation2 + $0xc8] sm:$0xff] }
 0x147   :  { %v2465_v27 = vpop.f32.mrb[40].mxu0 }
 0x148   :  { %579 = vst.msk [vmem:[#allocation2 + $0x148] sm:$0xff] %vm537_vm0, %v2465_v27  ;;  %v388_v28 = vpop.f32.mrb[41].mxu0  ;;  %v673_v27 = vld [vmem:[#allocation2 + $0x128] sm:$0xff] }
 0x149   :  { %578 = vst.msk [vmem:[#allocation2 + $0x140] sm:$0xff] %vm537_vm0, %v388_v28 }
 0x14b   :  { %v2468_v29 = vpop.f32.mrb[42].mxu0  ;;  %v675_v55 = vld [vmem:[#allocation2 + $0x138] sm:$0xff] }
 0x14c   :  { %581 = vst.msk [vmem:[#allocation2 + $0x158] sm:$0xff] %vm537_vm0, %v2468_v29  ;;  %v398_v30 = vpop.f32.mrb[43].mxu0  ;;  %v613_v29 = vld [vmem:[#allocation2 + $0x28] sm:$0xff]  ;;  %v674_v61 = vld [vmem:[#allocation2 + $0x130] sm:$0xff] }
 0x14d   :  { %580 = vst.msk [vmem:[#allocation2 + $0x150] sm:$0xff] %vm537_vm0, %v398_v30  ;;  %v634_v30 = vld [vmem:[#allocation2 + $0x98] sm:$0xff]  ;;  %v627_v51 = vmax.f32 %v613_v29, %v620_v17 }
 0x14f   :  { %v2471_v31 = vpop.f32.mrb[44].mxu0  ;;  %v641_v1 = vmax.f32 %v627_v51, %v634_v30  ;;  %v887_v51 = vld [vmem:[%s4574_s3 + $0x38] sm:$0xff] }
 0x150   :  { %583 = vst.msk [vmem:[#allocation2 + $0x168] sm:$0xff] %vm537_vm0, %v2471_v31  ;;  %v408_v32 = vpop.f32.mrb[45].mxu0  ;;  %v640_v31 = vmax.f32 %v626_v16, %v633_v12 }
 0x151   :  { %582 = vst.msk [vmem:[#allocation2 + $0x160] sm:$0xff] %vm537_vm0, %v408_v32  ;;  %v635_v32 = vld [vmem:[#allocation2 + $0xa0] sm:$0xff]  ;;  %v655_v16 = vmax.f32 %v641_v1, %v648_v53 }
 0x153   :  { %v2474_v33 = vpop.f32.mrb[46].mxu0 }
 0x154   :  { %585 = vst.msk [vmem:[#allocation2 + $0x178] sm:$0xff] %vm537_vm0, %v2474_v33  ;;  %v418_v34 = vpop.f32.mrb[47].mxu0  ;;  %v685_v14 = vld [vmem:[#allocation2 + $0x150] sm:$0xff]  ;;  %v646_v33 = vld [vmem:[#allocation2 + $0xc0] sm:$0xff] }
 0x155   :  { %584 = vst.msk [vmem:[#allocation2 + $0x170] sm:$0xff] %vm537_vm0, %v418_v34  ;;  %v666_v34 = vmax.f32 %v652_v19, %v659_v13 }
 0x157   :  { %v2477_v35 = vpop.f32.mrb[48].mxu0  ;;  %v680_v47 = vmax.f32 %v666_v34, %v673_v27  ;;  %v688_v11 = vld [vmem:[#allocation2 + $0x168] sm:$0xff]  ;;  %v669_v27 = vmax.f32 %v655_v16, %v662_v9 }
 0x158   :  { %587 = vst.msk [vmem:[#allocation2 + $0x188] sm:$0xff] %vm537_vm0, %v2477_v35  ;;  %v428_v36 = vpop.f32.mrb[49].mxu0  ;;  %v672_v35 = vld [vmem:[#allocation2 + $0x120] sm:$0xff]  ;;  %v889_v9 = vld [vmem:[%s4574_s3 + $0x48] sm:$0xff] }
 0x159   :  { %586 = vst.msk [vmem:[#allocation2 + $0x180] sm:$0xff] %vm537_vm0, %v428_v36  ;;  %v692_v36 = vmax.f32 %v678_v21, %v685_v14 }
 0x15b   :  { %v2480_v37 = vpop.f32.mrb[50].mxu0 }
 0x15c   :  { %589 = vst.msk [vmem:[#allocation2 + $0x198] sm:$0xff] %vm537_vm0, %v2480_v37  ;;  %v438_v38 = vpop.f32.mrb[51].mxu0  ;;  %v639_v37 = vmax.f32 %v625_v24, %v632_v18  ;;  %v689_v4 = vld [vmem:[#allocation2 + $0x170] sm:$0xff]  ;;  %v677_v18 = vld [vmem:[#allocation2 + $0x148] sm:$0xff] }
 0x15d   :  { %588 = vst.msk [vmem:[#allocation2 + $0x190] sm:$0xff] %vm537_vm0, %v438_v38  ;;  %v665_v38 = vmax.f32 %v651_v25, %v658_v20 }
 0x15e   :  { %v653_v52 = vmax.f32 %v639_v37, %v646_v33 }
 0x15f   :  { %v2483_v39 = vpop.f32.mrb[52].mxu0  ;;  %v699_v28 = vld [vmem:[#allocation2 + $0x188] sm:$0xff]  ;;  %v679_v54 = vmax.f32 %v665_v38, %v672_v35  ;;  %v690_v35 = vld [vmem:[#allocation2 + $0x178] sm:$0xff] }
 0x160   :  { %591 = vst.msk [vmem:[#allocation2 + $0x1a8] sm:$0xff] %vm537_vm0, %v2483_v39  ;;  %v448_v40 = vpop.f32.mrb[53].mxu0  ;;  %v661_v39 = vld [vmem:[#allocation2 + $0x100] sm:$0xff]  ;;  %v706_v49 = vmax.f32 %v692_v36, %v699_v28  ;;  %v667_v2 = vmax.f32 %v653_v52, %v660_v46 }
 0x161   :  { %590 = vst.msk [vmem:[#allocation2 + $0x1a0] sm:$0xff] %vm537_vm0, %v448_v40  ;;  %v687_v40 = vld [vmem:[#allocation2 + $0x160] sm:$0xff] }
 0x162   :  { %v694_v62 = vmax.f32 %v680_v47, %v687_v40  ;;  %v681_v17 = vmax.f32 %v667_v2, %v674_v61  ;;  %v691_v29 = vld [vmem:[#allocation2 + $0x180] sm:$0xff] }
 0x163   :  { %v2486_v41 = vpop.f32.mrb[54].mxu0  ;;  %v701_v56 = vld [vmem:[#allocation2 + $0x198] sm:$0xff] }
 0x164   :  { %593 = vst.msk [vmem:[#allocation2 + $0x1b8] sm:$0xff] %vm537_vm0, %v2486_v41  ;;  %v458_v42 = vpop.f32.mrb[55].mxu0  ;;  %v708_v12 = vmax.f32 %v694_v62, %v701_v56  ;;  %v695_v28 = vmax.f32 %v681_v17, %v688_v11  ;;  %v907_v11 = vld [vmem:[%s4574_s3 + $0xd8] sm:$0xff] }
 0x165   :  { %592 = vst.msk [vmem:[#allocation2 + $0x1b0] sm:$0xff] %vm537_vm0, %v458_v42 }
 0x167   :  { %v2489_v43 = vpop.f32.mrb[56].mxu0  ;;  %v703_v20 = vld [vmem:[#allocation2 + $0x1a8] sm:$0xff] }
 0x168   :  { %595 = vst.msk [vmem:[#allocation2 + $0x1c8] sm:$0xff] %vm537_vm0, %v2489_v43  ;;  %v468_v44 = vpop.f32.mrb[57].mxu0  ;;  %v628_v43 = vmax.f32 %v614_v23, %v621_v10  ;;  %v702_v24 = vld [vmem:[#allocation2 + $0x1a0] sm:$0xff] }
 0x169   :  { %594 = vst.msk [vmem:[#allocation2 + $0x1c0] sm:$0xff] %vm537_vm0, %v468_v44  ;;  %v654_v44 = vmax.f32 %v640_v31, %v647_v26 }
 0x16b   :  { %v2492_v48 = vpop.f32.mrb[58].mxu0  ;;  %v668_v59 = vmax.f32 %v654_v44, %v661_v39  ;;  %v705_v44 = vld [vmem:[#allocation2 + $0x1b8] sm:$0xff] }
 0x16c   :  { %597 = vst.msk [vmem:[#allocation2 + $0x1d8] sm:$0xff] %vm537_vm0, %v2492_v48  ;;  %v478_v50 = vpop.f32.mrb[59].mxu0  ;;  %v686_v48 = vld [vmem:[#allocation2 + $0x158] sm:$0xff]  ;;  %v704_v47 = vld [vmem:[#allocation2 + $0x1b0] sm:$0xff] }
 0x16d   :  { %596 = vst.msk [vmem:[#allocation2 + $0x1d0] sm:$0xff] %vm537_vm0, %v478_v50  ;;  %v693_v3 = vmax.f32 %v679_v54, %v686_v48  ;;  %v682_v10 = vmax.f32 %v668_v59, %v675_v55 }
 0x16f   :  { %v2495_v58 = vpop.f32.mrb[60].mxu0  ;;  %v714_v13 = vld [vmem:[#allocation2 + $0x1c8] sm:$0xff]  ;;  %v696_v23 = vmax.f32 %v682_v10, %v689_v4  ;;  %v906_v10 = vld [vmem:[%s4574_s3 + $0xd0] sm:$0xff] }
 0x170   :  { %599 = vst.msk [vmem:[#allocation2 + $0x1e8] sm:$0xff] %vm537_vm0, %v2495_v58  ;;  %v488_v63 = vpop.f32.mrb[61].mxu0  ;;  %v713_v41 = vld [vmem:[#allocation2 + $0x1c0] sm:$0xff]  ;;  %v642_v58 = vmax.f32 %v628_v43, %v635_v32  ;;  %v709_v43 = vmax.f32 %v695_v28, %v702_v24  ;;  %v905_v4 = vld [vmem:[%s4574_s3 + $0xc8] sm:$0xff]  ;;  %v2579_v16 = vpack.c.bf16 %v907_v11, %v906_v10  ;;  %v890_v24 = vld [vmem:[%s4574_s3 + $0x50] sm:$0xff] }
 0x171   :  { %598 = vst.msk [vmem:[#allocation2 + $0x1e0] sm:$0xff] %vm537_vm0, %v488_v63  ;;  %v700_v63 = vld [vmem:[#allocation2 + $0x190] sm:$0xff]  ;;  %v720_v0 = vmax.f32 %v706_v49, %v713_v41  ;;  %v710_v36 = vmax.f32 %v696_v23, %v703_v20 }
 0x172   :  { %v656_v8 = vmax.f32 %v642_v58, %v649_v45  ;;  %v707_v19 = vmax.f32 %v693_v3, %v700_v63  ;;  %v904_v3 = vld [vmem:[%s4574_s3 + $0xc0] sm:$0xff] }
 0x173   :  { %v2498_v15 = vpop.f32.mrb[62].mxu0  ;;  %v716_v37 = vld [vmem:[#allocation2 + $0x1d8] sm:$0xff] }
 0x174   :  { %601 = vst.msk [vmem:[#allocation2 + $0x1f8] sm:$0xff] %vm537_vm0, %v2498_v15  ;;  %v498_v22 = vpop.f32.mrb[63].mxu0  ;;  %v715_v5 = vld [vmem:[#allocation2 + $0x1d0] sm:$0xff]  ;;  %v670_v21 = vmax.f32 %v656_v8, %v663_v60  ;;  %v721_v30 = vmax.f32 %v707_v19, %v714_v13  ;;  %v723_v53 = vmax.f32 %v709_v43, %v716_v37  ;;  %v2575_v8 = vpack.c.bf16 %v905_v4, %v904_v3  ;;  %v892_v37 = vld [vmem:[%s4574_s3 + $0x60] sm:$0xff] }
 0x175   :  { %600 = vst.msk [vmem:[#allocation2 + $0x1f0] sm:$0xff] %vm537_vm0, %v498_v22  ;;  %v676_v22 = vld [vmem:[#allocation2 + $0x140] sm:$0xff]  ;;  %v722_v25 = vmax.f32 %v708_v12, %v715_v5  ;;  %v894_v43 = vld [vmem:[%s4574_s3 + $0x70] sm:$0xff] }
 0x176   :  { %v684_v34 = vmax.f32 %v670_v21, %v677_v18  ;;  %v888_v5 = vld [vmem:[%s4574_s3 + $0x40] sm:$0xff] }
 0x177   :  { %v2501_v42 = vpop.f32.mrb[64].mxu0  ;;  %v718_v60 = vld [vmem:[#allocation2 + $0x1e8] sm:$0xff] }
 0x178   :  { %603 = vst.msk [vmem:[#allocation2 + $0x208] sm:$0xff] %vm537_vm0, %v2501_v42  ;;  %v508_v50 = vpop.f32.mrb[65].mxu0  ;;  %v717_v31 = vld [vmem:[#allocation2 + $0x1e0] sm:$0xff]  ;;  %v683_v42 = vmax.f32 %v669_v27, %v676_v22  ;;  %v698_v46 = vmax.f32 %v684_v34, %v691_v29 }
 0x179   :  { %602 = vst.msk [vmem:[#allocation2 + $0x200] sm:$0xff] %vm537_vm0, %v508_v50  ;;  %v724_v48 = vmax.f32 %v710_v36, %v717_v31  ;;  %v886_v50 = vld [vmem:[%s4574_s3 + $0x30] sm:$0xff]  ;;  %v908_v34 = vld [vmem:[%s4574_s3 + $0xe0] sm:$0xff] }
 0x17a   :  { %v697_v52 = vmax.f32 %v683_v42, %v690_v35  ;;  %v2573_v58 = vpack.c.bf16 %v887_v51, %v886_v50  ;;  %v712_v59 = vmax.f32 %v698_v46, %v705_v44  ;;  %v909_v35 = vld [vmem:[%s4574_s3 + $0xe8] sm:$0xff]  ;;  %v895_v44 = vld [vmem:[%s4574_s3 + $0x78] sm:$0xff] }
 0x17b   :  { %v727_v6 = vld [vmem:[#allocation2 + $0x1f8] sm:$0xff]  ;;  %v2504_v7 = vpop.f32.mrb[66].mxu0  ;;  %v2583_v36 = vpack.c.bf16 %v909_v35, %v908_v34  ;;  %v2589_v46 = vpack.c.bf16 %v895_v44, %v894_v43  ;;  %v3024_v44 = vmov 0.0  }
 0x17c   :  { %v734_v14 = vmax.f32 %v720_v0, %v727_v6  ;;  %605 = vst.msk [vmem:[#allocation2 + $0x218] sm:$0xff] %vm537_vm0, %v2504_v7  ;;  %v518_v15 = vpop.f32.mrb[67].mxu0  ;;  %v719_v54 = vld [vmem:[#allocation2 + $0x1f0] sm:$0xff]  ;;  %v711_v0 = vmax.f32 %v697_v52, %v704_v47  ;;  %2574 = vmatpush3.bf16.msra.mxu1 %v2573_v58 }
 0x17d   :  { %604 = vst.msk [vmem:[#allocation2 + $0x210] sm:$0xff] %vm537_vm0, %v518_v15  ;;  %v726_v6 = vmax.f32 %v712_v59, %v719_v54  ;;  %v2577_v15 = vpack.c.bf16 %v889_v9, %v888_v5  ;;  %2576 = vmatprep.subr.bf16.mxu1 %v2575_v8 }
 0x17e   :  { %v748_v26 = vadd.f32 %v3449_v57, %v734_v14  ;;  %v725_v12 = vmax.f32 %v711_v0, %v718_v60 }
 0x17f   :  { %v729_v32 = vld [vmem:[#allocation2 + $0x208] sm:$0xff]  ;;  %v2507_v33 = vpop.f32.mrb[68].mxu0 }
 0x180   :  { %v755_v38 = vmax.f32 %v748_v26, 0.0  ;;  %v736_v39 = vmax.f32 %v722_v25, %v729_v32  ;;  %v728_v40 = vld [vmem:[#allocation2 + $0x200] sm:$0xff]  ;;  %607 = vst.msk [vmem:[#allocation2 + $0x228] sm:$0xff] %vm537_vm0, %v2507_v33  ;;  %v528_v41 = vpop.f32.mrb[69].mxu0  ;;  %2578 = vmatpush3.bf16.msra.mxu1 %v2577_v15  ;;  %v891_v25 = vld [vmem:[%s4574_s3 + $0x58] sm:$0xff] }
 0x181   :  { %v735_v45 = vmax.f32 %v721_v30, %v728_v40  ;;  %606 = vst.msk [vmem:[#allocation2 + $0x220] sm:$0xff] %vm537_vm0, %v528_v41  ;;  %2580 = vmatprep.subr.bf16.mxu1 %v2579_v16  ;;  %v2581_v27 = vpack.c.bf16 %v891_v25, %v890_v24  ;;  %v910_v40 = vld [vmem:[%s4574_s3 + $0xf0] sm:$0xff]  ;;  %v911_v41 = vld [vmem:[%s4574_s3 + $0xf8] sm:$0xff] }
 0x182   :  { %762 = vst.msk [vmem:[#allocation3] sm:$0xff] %vm537_vm0, %v755_v38  ;;  %v750_v49 = vadd.f32 %v3449_v57, %v736_v39  ;;  %v893_v38 = vld [vmem:[%s4574_s3 + $0x68] sm:$0xff]  ;;  %v2587_v42 = vpack.c.bf16 %v911_v41, %v910_v40  ;;  %v914_v41 = vld [vmem:[%s4574_s3 + $0x110] sm:$0xff] }
 0x183   :  { %v749_v55 = vadd.f32 %v3449_v57, %v735_v45  ;;  %v731_v56 = vld [vmem:[#allocation2 + $0x218] sm:$0xff]  ;;  %v2585_v39 = vpack.c.bf16 %v893_v38, %v892_v37 }
 0x184   :  { %v757_v61 = vmax.f32 %v750_v49, 0.0  ;;  %v738_v62 = vmax.f32 %v724_v48, %v731_v56  ;;  %v730_v63 = vld [vmem:[#allocation2 + $0x210] sm:$0xff]  ;;  %2582 = vmatpush3.bf16.msra.mxu1 %v2581_v27  ;;  %v3019_v56 = vmov 0.0|0.0  }
 0x185   :  { %v756_v1 = vmax.f32 %v749_v55, 0.0  ;;  %v737_v2 = vmax.f32 %v723_v53, %v730_v63  ;;  %2584 = vmatprep.subr.bf16.mxu1 %v2583_v36 }
 0x186   :  { %764 = vst.msk [vmem:[#allocation3 + $0x10] sm:$0xff] %vm537_vm0, %v757_v61  ;;  %v752_v7 = vadd.f32 %v3449_v57, %v738_v62 }
 0x187   :  { %763 = vst.msk [vmem:[#allocation3 + $0x8] sm:$0xff] %vm537_vm0, %v756_v1  ;;  %v751_v13 = vadd.f32 %v3449_v57, %v737_v2  ;;  %v733_v14 = vld [vmem:[#allocation2 + $0x228] sm:$0xff] }
 0x188   :  { %v759_v17 = vmax.f32 %v752_v7, 0.0  ;;  %v740_v18 = vmax.f32 %v726_v6, %v733_v14  ;;  %v732_v19 = vld [vmem:[#allocation2 + $0x220] sm:$0xff]  ;;  %2586 = vmatpush3.bf16.msra.mxu1 %v2585_v39 }
 0x189   :  { %v758_v20 = vmax.f32 %v751_v13, 0.0  ;;  %v739_v21 = vmax.f32 %v725_v12, %v732_v19  ;;  %2588 = vmatprep.subr.bf16.mxu1 %v2587_v42  ;;  %v769_v10 = vld [vmem:[#allocation3] sm:$0xff]  ;;  %v915_v42 = vld [vmem:[%s4574_s3 + $0x118] sm:$0xff] }
 0x18a   :  { %766 = vst.msk [vmem:[#allocation3 + $0x20] sm:$0xff] %vm537_vm0, %v759_v17  ;;  %v754_v22 = vadd.f32 %v3449_v57, %v740_v18  ;;  %v2595_v43 = vpack.c.bf16 %v915_v42, %v914_v41  ;;  %v1084_v42 = vld [vmem:[%s4576_s5 + $0x10] sm:$0xff] }
 0x18b   :  { %765 = vst.msk [vmem:[#allocation3 + $0x18] sm:$0xff] %vm537_vm0, %v758_v20  ;;  %v753_v23 = vadd.f32 %v3449_v57, %v739_v21 }
 0x18c   :  { %v761_v26 = vmax.f32 %v754_v22, 0.0  ;;  %2590 = vmatpush3.bf16.msra.mxu1 %v2589_v46  ;;  %v917_v46 = vld [vmem:[%s4574_s3 + $0x128] sm:$0xff] }
 0x18d   :  { %v760_v28 = vmax.f32 %v753_v23, 0.0  ;;  %2591 = vmatprep.subr.bf16.mxu1 %v3019_v56 }
 0x18e   :  { %v773_v29 = vld [vmem:[#allocation3 + $0x4] sm:$0xff]  ;;  %v781_v30 = vld [vmem:[#allocation3 + $0xc] sm:$0xff]  ;;  %768 = vst.msk [vmem:[#allocation3 + $0x30] sm:$0xff] %vm537_vm0, %v761_v26 }
 0x18f   :  { %v771_v31 = vld [vmem:[#allocation3 + $0x2] sm:$0xff]  ;;  %767 = vst.msk [vmem:[#allocation3 + $0x28] sm:$0xff] %vm537_vm0, %v760_v28  ;;  %v2939_v57 = vpack.i.bf16 %v773_v29, %v781_v30  ;;  %v779_v32 = vld [vmem:[#allocation3 + $0xa] sm:$0xff] }
 0x190   :  { %v2934_v33 = vpack.i.bf16 %v771_v31, %v779_v32  ;;  %v775_v52 = vld [vmem:[#allocation3 + $0x6] sm:$0xff]  ;;  %v783_v53 = vld [vmem:[#allocation3 + $0xe] sm:$0xff]  ;;  %v913_v31 = vld [vmem:[%s4574_s3 + $0x108] sm:$0xff] }
 0x191   :  { %2940 = vrot.lane.b32.xlu1 %v2939_v57, %s3015_s25  ;;  %v2954_v58 = vpack.i.bf16 %v775_v52, %v783_v53  ;;  %v776_v61 = vld [vmem:[#allocation3 + $0x20] sm:$0xff]  ;;  %v777_v11 = vld [vmem:[#allocation3 + $0x8] sm:$0xff]  ;;  %v912_v30 = vld [vmem:[%s4574_s3 + $0x100] sm:$0xff]  ;;  %s2991_s25 = scalar_lea.vmem %s2187_s2, 32 }
 0x192   :  { %2935 = vrot.lane.b32.xlu0 %v2934_v33, %s3016_s30  ;;  %v772_v45 = vld [vmem:[#allocation3 + $0x1c] sm:$0xff]  ;;  %v787_v1 = vld [vmem:[#allocation3 + $0x12] sm:$0xff]  ;;  %v2592_v38 = vpack.c.bf16 %v913_v31, %v912_v30  ;;  %v2195_v31 = vld [vmem:[%s4575_s4] ss:$0 sm:$0xff]  ;;  %p2992_p0 = scmp.ne.s32.totalorder %s2187_s2, %s2991_s25  ;;  %p2997_p2 = scmp.lt.s32.totalorder %s2991_s25, %s2991_s25 }
 0x193   :  { %v770_v48 = vld [vmem:[#allocation3 + $0x1a] sm:$0xff]  ;;  %v785_v53 = vld [vmem:[#allocation3 + $0x10] sm:$0xff] }
 0x194   :  { %v774_v55 = vld [vmem:[#allocation3 + $0x1e] sm:$0xff]  ;;  %p2998_p3 = por %p2997_p2, %p2996_p1 }
 0x196   :  { %v780_v47 = vld [vmem:[#allocation3 + $0x24] sm:$0xff]  ;;  %v788_v0 = vld [vmem:[#allocation3 + $0x2c] sm:$0xff]  ;;  %p2999_p4 = pnand %p2998_p3, %p2992_p0 }
 0x197   :  { %v778_v49 = vld [vmem:[#allocation3 + $0x22] sm:$0xff]  ;;  %v2949_v50 = vpack.i.bf16 %v772_v45, %v780_v47  ;;  %v786_v63 = vld [vmem:[#allocation3 + $0x2a] sm:$0xff] }
 0x198   :  { %v2944_v51 = vpack.i.bf16 %v770_v48, %v778_v49  ;;  %v782_v54 = vld [vmem:[#allocation3 + $0x26] sm:$0xff]  ;;  %v916_v45 = vld [vmem:[%s4574_s3 + $0x120] sm:$0xff] }
 0x199   :  { %2950 = vrot.lane.b32.xlu1 %v2949_v50, %s3017_s0  ;;  %v2959_v59 = vpack.i.bf16 %v774_v55, %v782_v54  ;;  %v784_v60 = vld [vmem:[#allocation3 + $0x28] sm:$0xff]  ;;  %v2598_v47 = vpack.c.bf16 %v917_v46, %v916_v45  ;;  %v918_v49 = vld [vmem:[%s4574_s3 + $0x130] sm:$0xff] }
 0x19a   :  { %2945 = vrot.lane.b32.xlu0 %v2944_v51, %s3018_s18  ;;  %v2964_v62 = vpack.i.bf16 %v776_v61, %v784_v60  ;;  %v919_v50 = vld [vmem:[%s4574_s3 + $0x138] sm:$0xff]  ;;  %v1083_v60 = vld [vmem:[%s4576_s5 + $0x8] sm:$0xff] }
 0x19b   :  { %v2601_v52 = vpack.c.bf16 %v919_v50, %v918_v49  ;;  %v1101_v45 = vld [vmem:[%s4576_s5 + $0x98] sm:$0xff]  ;;  %v1100_v49 = vld [vmem:[%s4576_s5 + $0x90] sm:$0xff] }
 0x19c   :  { %v1109_v46 = vld [vmem:[%s4576_s5 + $0xd8] sm:$0xff]  ;;  %v1108_v50 = vld [vmem:[%s4576_s5 + $0xd0] sm:$0xff] }
 0x19d   :  { %2955 = vrot.lane.b32.xlu1 %v2954_v58, %s3020_s19 }
 0x19e   :  { %2960 = vrot.lane.b32.xlu0 %v2959_v59, %s3021_s20 }
 0x1a1   :  { %866 = vrot.lane.b32.xlu1 %v786_v63, %s3018_s18  ;;  %v1090_v63 = vld [vmem:[%s4576_s5 + $0x40] sm:$0xff] }
 0x1a2   :  { %2965 = vrot.lane.b32.xlu0 %v2964_v62, %s3022_s21  ;;  %v1082_v62 = vld [vmem:[%s4576_s5] sm:$0xff] }
 0x1a5   :  { %874 = vrot.lane.b32.xlu1 %v788_v0, %s3017_s0  ;;  %v2605_v0 = vpack.c.bf16 %v1090_v63, %v1082_v62  ;;  %v1102_v63 = vld [vmem:[%s4576_s5 + $0xa0] sm:$0xff] }
 0x1a6   :  { %870 = vrot.lane.b32.xlu0 %v787_v1, %s3016_s30  ;;  %v1099_v1 = vld [vmem:[%s4576_s5 + $0x88] sm:$0xff] }
 0x203   :  { %v2941_v2 = vpop.permute.xlu1 %2940 }
 0x204   :  { %v2936_v3 = vpop.permute.xlu0 %2935  ;;  %v2943_v20 = vunpack.i.h.bf16 %v2941_v2  ;;  %v2942_v21 = vunpack.i.l.bf16 %v2941_v2  ;;  %v1107_v2 = vld [vmem:[%s4576_s5 + $0xc8] sm:$0xff] }
 0x205   :  { %v2938_v8 = vunpack.i.h.bf16 %v2936_v3  ;;  %v2937_v9 = vunpack.i.l.bf16 %v2936_v3  ;;  %v1098_v3 = vld [vmem:[%s4576_s5 + $0x80] sm:$0xff] }
 0x20b   :  { %v2951_v4 = vpop.permute.xlu1 %2950 }
 0x20c   :  { %v2946_v5 = vpop.permute.xlu0 %2945  ;;  %v2953_v14 = vunpack.i.h.bf16 %v2951_v4  ;;  %v2952_v15 = vunpack.i.l.bf16 %v2951_v4  ;;  %v2607_v4 = vpack.c.bf16 %v1107_v2, %v1099_v1  ;;  %v1089_v1 = vld [vmem:[%s4576_s5 + $0x38] sm:$0xff] }
 0x20d   :  { %v2948_v6 = vunpack.i.h.bf16 %v2946_v5  ;;  %v2947_v7 = vunpack.i.l.bf16 %v2946_v5  ;;  %v1106_v5 = vld [vmem:[%s4576_s5 + $0xc0] sm:$0xff]  ;;  %v1097_v2 = vld [vmem:[%s4576_s5 + $0x78] sm:$0xff] }
 0x20f   :  { %v845_v12 = vsel %vm537_vm0, %v769_v10, %v2948_v6  ;;  %v858_v13 = vsel %vm537_vm0, %v777_v11, %v2947_v7  ;;  %v2956_v18 = vpop.permute.xlu1 %2955  ;;  %v1085_v6 = vld [vmem:[%s4576_s5 + $0x18] sm:$0xff] }
 0x210   :  { %v847_v16 = vsel %vm846_vm1, %v845_v12, %v2938_v8  ;;  %v859_v17 = vsel %vm846_vm1, %v858_v13, %v2937_v9  ;;  %v2961_v19 = vpop.permute.xlu0 %2960  ;;  %v2958_v24 = vunpack.i.h.bf16 %v2956_v18  ;;  %v2957_v25 = vunpack.i.l.bf16 %v2956_v18  ;;  %v1093_v7 = vld [vmem:[%s4576_s5 + $0x58] sm:$0xff]  ;;  %v1487_v12 = vld [vmem:[%s4577_s6 + $0x10] sm:$0xff] }
 0x211   :  { %v2963_v22 = vunpack.i.h.bf16 %v2961_v19  ;;  %v2962_v23 = vunpack.i.l.bf16 %v2961_v19  ;;  %v849_v26 = vsel %vm848_vm2, %v847_v16, %v2953_v14  ;;  %v860_v27 = vsel %vm848_vm2, %v859_v17, %v2952_v15  ;;  %v1488_v10 = vld [vmem:[%s4577_s6 + $0x18] sm:$0xff]  ;;  %v1495_v14 = vld [vmem:[%s4577_s6 + $0x50] sm:$0xff] }
 0x212   :  { %v861_v28 = vsel %vm850_vm3, %v860_v27, %v2942_v21  ;;  %v851_v29 = vsel %vm850_vm3, %v849_v26, %v2943_v20  ;;  %v2609_v8 = vpack.c.bf16 %v1106_v5, %v1098_v3  ;;  %v2611_v9 = vpack.c.bf16 %v1093_v7, %v1085_v6  ;;  %v1496_v11 = vld [vmem:[%s4577_s6 + $0x58] sm:$0xff]  ;;  %v1503_v19 = vld [vmem:[%s4577_s6 + $0x90] sm:$0xff] }
 0x213   :  { %v862_v32 = vsel %vm852_vm4, %v861_v28, %v2962_v23  ;;  %v853_v33 = vsel %vm852_vm4, %v851_v29, %v2963_v22  ;;  %v867_v48 = vpop.permute.xlu1 %866  ;;  %v2699_v13 = vpack.c.bf16 %v1496_v11, %v1488_v10  ;;  %v1504_v15 = vld [vmem:[%s4577_s6 + $0x98] sm:$0xff]  ;;  %v2701_v17 = vpack.c.bf16 %v1495_v14, %v1487_v12  ;;  %v1511_v20 = vld [vmem:[%s4577_s6 + $0xd0] sm:$0xff]  ;;  %v1486_v14 = vld [vmem:[%s4577_s6 + $0x8] sm:$0xff] }
 0x214   :  { %v2966_v57 = vpop.permute.xlu0 %2965  ;;  %v863_v36 = vsel %vm854_vm5, %v862_v32, %v2957_v25  ;;  %v855_v37 = vsel %vm854_vm5, %v853_v33, %v2958_v24  ;;  %v877_v54 = vsel %vm537_vm0, %v785_v53, %v867_v48  ;;  %v1512_v16 = vld [vmem:[%s4577_s6 + $0xd8] sm:$0xff]  ;;  %v2705_v23 = vpack.c.bf16 %v1511_v20, %v1503_v19  ;;  %v1519_v25 = vld [vmem:[%s4577_s6 + $0x110] sm:$0xff]  ;;  %v1095_v53 = vld [vmem:[%s4576_s5 + $0x68] sm:$0xff] }
 0x215   :  { %v2968_v34 = vunpack.i.h.bf16 %v2966_v57  ;;  %v2967_v35 = vunpack.i.l.bf16 %v2966_v57  ;;  %v2703_v18 = vpack.c.bf16 %v1512_v16, %v1504_v15  ;;  %v1520_v21 = vld [vmem:[%s4577_s6 + $0x118] sm:$0xff]  ;;  %2700 = vmatprep.subr.bf16.mxu0 %v2699_v13  ;;  %v1527_v26 = vld [vmem:[%s4577_s6 + $0x150] sm:$0xff]  ;;  %v2615_v48 = vpack.c.bf16 %v1109_v46, %v1101_v45  ;;  %v1494_v15 = vld [vmem:[%s4577_s6 + $0x48] sm:$0xff] }
 0x216   :  { %v1528_v22 = vld [vmem:[%s4577_s6 + $0x158] sm:$0xff]  ;;  %2702 = vmatpush1.bf16.msra.mxu0 %v2701_v17  ;;  %v2709_v27 = vpack.c.bf16 %v1527_v26, %v1519_v25  ;;  %v1088_v5 = vld [vmem:[%s4576_s5 + $0x30] sm:$0xff]  ;;  %v2635_v16 = vpack.c.bf16 %v1494_v15, %v1486_v14  ;;  %v1485_v17 = vld [vmem:[%s4577_s6] sm:$0xff] }
 0x217   :  { %v864_v39 = vsel %vm856_vm6, %v863_v36, %v2967_v35  ;;  %v857_v40 = vsel %vm856_vm6, %v855_v37, %v2968_v34  ;;  %v875_v55 = vpop.permute.xlu1 %874  ;;  %2704 = vmatprep.subr.bf16.mxu0 %v2703_v18  ;;  %v2707_v24 = vpack.c.bf16 %v1528_v22, %v1520_v21  ;;  %v1096_v6 = vld [vmem:[%s4576_s5 + $0x70] sm:$0xff]  ;;  %v1105_v7 = vld [vmem:[%s4576_s5 + $0xb8] sm:$0xff]  ;;  %v1502_v19 = vld [vmem:[%s4577_s6 + $0x88] sm:$0xff] }
 0x218   :  { %994 = vmatprep.mubr.f32.mxu1 %v864_v39  ;;  %v871_v51 = vpop.permute.xlu0 %870  ;;  %v1104_v11 = vld [vmem:[%s4576_s5 + $0xb0] sm:$0xff]  ;;  %v1510_v20 = vld [vmem:[%s4577_s6 + $0xc8] sm:$0xff]  ;;  %v1501_v22 = vld [vmem:[%s4577_s6 + $0x80] sm:$0xff] }
 0x219   :  { %995 = vmatmul.mubr.f32.vlgmr.msra.gmra.mrb[0].mxu1 %v857_v40  ;;  %v878_v58 = vsel %vm846_vm1, %v877_v54, %v871_v51  ;;  %v2617_v54 = vpack.c.bf16 %v1108_v50, %v1100_v49  ;;  %v1112_v12 = vld [vmem:[%s4576_s5 + $0xf0] sm:$0xff]  ;;  %v2639_v21 = vpack.c.bf16 %v1510_v20, %v1502_v19  ;;  %v1518_v25 = vld [vmem:[%s4577_s6 + $0x108] sm:$0xff]  ;;  %v1608_v19 = vld [vmem:[%s4577_s6 + $0x3d8] sm:$0xff] }
 0x21a   :  { %2593 = vmatpush3.bf16.msra.mxu1 %v2592_v38  ;;  %2524 = vmatprep.mubr.msk.f32.mxu1 %vm3023_vm7, %v3024_v44  ;;  %v879_v59 = vsel %vm848_vm2, %v878_v58, %v875_v55  ;;  %v1086_v58 = vld [vmem:[%s4576_s5 + $0x20] sm:$0xff]  ;;  %v2633_v13 = vpack.c.bf16 %v1112_v12, %v1104_v11  ;;  %v1526_v26 = vld [vmem:[%s4577_s6 + $0x148] sm:$0xff]  ;;  %v1591_v14 = vld [vmem:[%s4577_s6 + $0x350] sm:$0xff] }
 0x21b   :  { %2594 = vmatprep.subr.bf16.mxu1 %v3019_v56  ;;  %2706 = vmatpush1.bf16.msra.mxu0 %v2705_v23  ;;  %v1509_v23 = vld [vmem:[%s4577_s6 + $0xc0] sm:$0xff]  ;;  %v1550_v45 = vld [vmem:[%s4577_s6 + $0x208] sm:$0xff] }
 0x21c   :  { %2708 = vmatprep.subr.bf16.mxu0 %v2707_v24  ;;  %v2641_v24 = vpack.c.bf16 %v1509_v23, %v1501_v22  ;;  %v1558_v49 = vld [vmem:[%s4577_s6 + $0x248] sm:$0xff]  ;;  %v1597_v20 = vld [vmem:[%s4577_s6 + $0x380] sm:$0xff] }
 0x21e   :  { %2596 = vmatpush3.bf16.msra.mxu1 %v2595_v43  ;;  %v1092_v43 = vld [vmem:[%s4576_s5 + $0x50] sm:$0xff] }
 0x21f   :  { %2597 = vmatprep.subr.bf16.mxu1 %v3019_v56  ;;  %2710 = vmatpush1.bf16.msra.mxu0 %v2709_v27  ;;  %v2643_v27 = vpack.c.bf16 %v1526_v26, %v1518_v25  ;;  %v1607_v25 = vld [vmem:[%s4577_s6 + $0x3d0] sm:$0xff]  ;;  %v1614_v26 = vld [vmem:[%s4577_s6 + $0x408] sm:$0xff] }
 0x222   :  { %2599 = vmatpush3.bf16.msra.mxu1 %v2598_v47  ;;  %v2613_v47 = vpack.c.bf16 %v1092_v43, %v1084_v42  ;;  %v1552_v42 = vld [vmem:[%s4577_s6 + $0x218] sm:$0xff] }
 0x223   :  { %2600 = vmatprep.subr.bf16.mxu1 %v3019_v56  ;;  %v1091_v56 = vld [vmem:[%s4576_s5 + $0x48] sm:$0xff]  ;;  %v1560_v43 = vld [vmem:[%s4577_s6 + $0x258] sm:$0xff] }
 0x224   :  { %v2603_v61 = vpack.c.bf16 %v1091_v56, %v1083_v60  ;;  %v1103_v60 = vld [vmem:[%s4576_s5 + $0xa8] sm:$0xff]  ;;  %v2715_v46 = vpack.c.bf16 %v1560_v43, %v1552_v42  ;;  %v1640_v42 = vld [vmem:[%s4577_s6 + $0x4d8] sm:$0xff]  ;;  %v1629_v43 = vld [vmem:[%s4577_s6 + $0x480] sm:$0xff] }
 0x225   :  { %v1111_v56 = vld [vmem:[%s4576_s5 + $0xe8] sm:$0xff] }
 0x226   :  { %2602 = vmatpush3.bf16.msra.mxu1 %v2601_v52  ;;  %v1087_v52 = vld [vmem:[%s4576_s5 + $0x28] sm:$0xff]  ;;  %v2623_v62 = vpack.c.bf16 %v1111_v56, %v1103_v60  ;;  %v1567_v56 = vld [vmem:[%s4577_s6 + $0x290] sm:$0xff] }
 0x227   :  { %2604 = vmatprep.subr.bf16.mxu1 %v2603_v61  ;;  %v2619_v55 = vpack.c.bf16 %v1095_v53, %v1087_v52  ;;  %v1549_v52 = vld [vmem:[%s4577_s6 + $0x200] sm:$0xff] }
 0x228   :  { %v1557_v53 = vld [vmem:[%s4577_s6 + $0x240] sm:$0xff] }
 0x229   :  { %2525 = vmatmul.mubr.msk.f32.vlgmr.msra.gmra.mrb[2].mxu1 %vm850_vm3, %v879_v59  ;;  %v1094_v59 = vld [vmem:[%s4576_s5 + $0x60] sm:$0xff] }
 0x22a   :  { %1223 = vmatprep.mubr.f32.mxu1 %v3024_v44  ;;  %2606 = vmatpush1.bf16.msra.mxu1 %v2605_v0  ;;  %v2621_v61 = vpack.c.bf16 %v1094_v59, %v1086_v58  ;;  %v1110_v0 = vld [vmem:[%s4576_s5 + $0xe0] sm:$0xff]  ;;  %v1576_v58 = vld [vmem:[%s4577_s6 + $0x2d8] sm:$0xff]  ;;  %v1566_v59 = vld [vmem:[%s4577_s6 + $0x288] sm:$0xff] }
 0x22b   :  { %2608 = vmatprep.subr.bf16.mxu1 %v2607_v4  ;;  %v2625_v3 = vpack.c.bf16 %v1110_v0, %v1102_v63  ;;  %v2627_v4 = vpack.c.bf16 %v1097_v2, %v1089_v1  ;;  %v1565_v1 = vld [vmem:[%s4577_s6 + $0x280] sm:$0xff] }
 0x22c   :  { %v1573_v2 = vld [vmem:[%s4577_s6 + $0x2c0] sm:$0xff] }
 0x22e   :  { %2610 = vmatpush1.bf16.msra.mxu1 %v2609_v8  ;;  %v1113_v8 = vld [vmem:[%s4576_s5 + $0xf8] sm:$0xff] }
 0x22f   :  { %2612 = vmatprep.subr.bf16.mxu1 %v2611_v9  ;;  %v2629_v9 = vpack.c.bf16 %v1096_v6, %v1088_v5  ;;  %v2631_v10 = vpack.c.bf16 %v1113_v8, %v1105_v7  ;;  %v1590_v5 = vld [vmem:[%s4577_s6 + $0x348] sm:$0xff]  ;;  %v1584_v6 = vld [vmem:[%s4577_s6 + $0x318] sm:$0xff] }
 0x230   :  { %v1592_v8 = vld [vmem:[%s4577_s6 + $0x358] sm:$0xff] }
 0x231   :  { %v2723_v11 = vpack.c.bf16 %v1592_v8, %v1584_v6  ;;  %v1663_v8 = vld [vmem:[%s4577_s6 + $0x590] sm:$0xff] }
 0x2ec   :  { %v2324_v28 = vpop.f32.mrb[0].mxu1 }
 0x2ed   :  { %v2325_v29 = vpop.f32.mrb[1].mxu1 }
 0x2ee   :  { %v2326_v30 = vadd.f32 %v2325_v29, %v2324_v28  ;;  %v1517_v28 = vld [vmem:[%s4577_s6 + $0x100] sm:$0xff] }
 0x2ef   :  { %v1525_v29 = vld [vmem:[%s4577_s6 + $0x140] sm:$0xff] }
 0x2f0   :  { %v997_v57 = vadd.f32 %v2326_v30, %v2195_v31  ;;  %v2645_v30 = vpack.c.bf16 %v1525_v29, %v1517_v28  ;;  %v1536_v31 = vld [vmem:[%s4577_s6 + $0x198] sm:$0xff]  ;;  %v1622_v28 = vld [vmem:[%s4577_s6 + $0x448] sm:$0xff] }
 0x2f1   :  { %v1616_v29 = vld [vmem:[%s4577_s6 + $0x418] sm:$0xff] }
 0x2fc   :  { %v1066_v32 = vpop.f32.mrb[2].mxu1 }
 0x2fd   :  { %v1067_v33 = vadd.f32 %v1066_v32, %v997_v57  ;;  %v2526_v34 = vpop.f32.mrb[3].mxu1  ;;  %v1544_v57 = vld [vmem:[%s4577_s6 + $0x1d8] sm:$0xff]  ;;  %v1534_v32 = vld [vmem:[%s4577_s6 + $0x188] sm:$0xff] }
 0x2fe   :  { %v1535_v34 = vld [vmem:[%s4577_s6 + $0x190] sm:$0xff] }
 0x2ff   :  { %v1070_v35 = vmax.f32 %v1067_v33, 0.0  ;;  %v2711_v33 = vpack.c.bf16 %v1544_v57, %v1536_v31  ;;  %v2667_v31 = vpack.c.bf16 %v1622_v28, %v1614_v26  ;;  %v1701_v28 = vld [vmem:[%s4577_s6 + $0x6c0] sm:$0xff] }
 0x301   :  { %1071 = vst.msk [vmem:[#allocation4] sm:$0xff] %vm846_vm1, %v1070_v35  ;;  %v1543_v35 = vld [vmem:[%s4577_s6 + $0x1d0] sm:$0xff]  ;;  %2712 = vmatprep.subr.bf16.mxu0 %v2711_v33  ;;  %v1621_v33 = vld [vmem:[%s4577_s6 + $0x440] sm:$0xff] }
 0x308   :  { %v1072_v36 = vld [vmem:[#allocation4] sm:$0x3]  ;;  %v1073_v37 = vld [vmem:[#allocation4 + $0x2] sm:$0x3]  ;;  %v1077_v38 = vld [vmem:[#allocation4 + $0x4] sm:$0x3] }
 0x309   :  { %v1074_v39 = vmax.f32 %v1072_v36, %v1073_v37  ;;  %v1078_v40 = vld [vmem:[#allocation4 + $0x6] sm:$0x3]  ;;  %v2713_v37 = vpack.c.bf16 %v1543_v35, %v1535_v34  ;;  %v1615_v34 = vld [vmem:[%s4577_s6 + $0x410] sm:$0xff] }
 0x30a   :  { %v1079_v41 = vmax.f32 %v1077_v38, %v1078_v40  ;;  %v1542_v36 = vld [vmem:[%s4577_s6 + $0x1c8] sm:$0xff]  ;;  %v1541_v40 = vld [vmem:[%s4577_s6 + $0x1c0] sm:$0xff] }
 0x30b   :  { %1076 = vst.msk [vmem:[#allocation5] sm:$0x3] %vm1075_vm8, %v1074_v39  ;;  %v2647_v38 = vpack.c.bf16 %v1542_v36, %v1534_v32  ;;  %v1533_v39 = vld [vmem:[%s4577_s6 + $0x180] sm:$0xff]  ;;  %2714 = vmatpush1.bf16.msra.mxu0 %v2713_v37  ;;  %v1623_v36 = vld [vmem:[%s4577_s6 + $0x450] sm:$0xff]  ;;  %v1630_v37 = vld [vmem:[%s4577_s6 + $0x488] sm:$0xff] }
 0x30c   :  { %1080 = vst.msk [vmem:[#allocation5 + $0x2] sm:$0x3] %vm1075_vm8, %v1079_v41  ;;  %v2649_v41 = vpack.c.bf16 %v1541_v40, %v1533_v39  ;;  %2716 = vmatprep.subr.bf16.mxu0 %v2715_v46  ;;  %v1613_v32 = vld [vmem:[%s4577_s6 + $0x400] sm:$0xff]  ;;  %v2733_v39 = vpack.c.bf16 %v1623_v36, %v1615_v34  ;;  %v1712_v34 = vld [vmem:[%s4577_s6 + $0x718] sm:$0xff] }
 0x30d   :  { %v2669_v35 = vpack.c.bf16 %v1621_v33, %v1613_v32  ;;  %v1637_v46 = vld [vmem:[%s4577_s6 + $0x4c0] sm:$0xff]  ;;  %v1710_v32 = vld [vmem:[%s4577_s6 + $0x708] sm:$0xff] }
 0x30e   :  { %v1718_v33 = vld [vmem:[%s4577_s6 + $0x748] sm:$0xff] }
 0x313   :  { %v1081_v51 = vld [vmem:[#allocation5] sm:$0xf] }
 0x314   :  { %2197 = vmatmul.mubr.msk.f32.vlgmr.msra.gmra.mrb[4].mxu1 %vm846_vm1, %v1081_v51 }
 0x315   :  { %2614 = vmatpush1.bf16.msra.mxu1 %v2613_v47  ;;  %1294 = vmatprep.mubr.f32.mxu1 %v3024_v44  ;;  %v1551_v47 = vld [vmem:[%s4577_s6 + $0x210] sm:$0xff] }
 0x316   :  { %2616 = vmatprep.subr.bf16.mxu1 %v2615_v48  ;;  %v1559_v48 = vld [vmem:[%s4577_s6 + $0x250] sm:$0xff] }
 0x317   :  { %v2717_v50 = vpack.c.bf16 %v1559_v48, %v1551_v47  ;;  %v1631_v47 = vld [vmem:[%s4577_s6 + $0x490] sm:$0xff] }
 0x318   :  { %v1639_v48 = vld [vmem:[%s4577_s6 + $0x4d0] sm:$0xff] }
 0x319   :  { %2618 = vmatpush1.bf16.msra.mxu1 %v2617_v54  ;;  %v2653_v54 = vpack.c.bf16 %v1557_v53, %v1549_v52  ;;  %2718 = vmatpush1.bf16.msra.mxu0 %v2717_v50  ;;  %v1654_v50 = vld [vmem:[%s4577_s6 + $0x548] sm:$0xff]  ;;  %v2673_v52 = vpack.c.bf16 %v1637_v46, %v1629_v43  ;;  %v2737_v53 = vpack.c.bf16 %v1639_v48, %v1631_v47  ;;  %v1719_v43 = vld [vmem:[%s4577_s6 + $0x750] sm:$0xff]  ;;  %v1728_v47 = vld [vmem:[%s4577_s6 + $0x798] sm:$0xff] }
 0x31a   :  { %2620 = vmatprep.subr.bf16.mxu1 %v2619_v55  ;;  %v1568_v55 = vld [vmem:[%s4577_s6 + $0x298] sm:$0xff]  ;;  %v1734_v46 = vld [vmem:[%s4577_s6 + $0x7c8] sm:$0xff] }
 0x31b   :  { %v2719_v60 = vpack.c.bf16 %v1576_v58, %v1568_v55  ;;  %v1645_v55 = vld [vmem:[%s4577_s6 + $0x500] sm:$0xff]  ;;  %v1736_v48 = vld [vmem:[%s4577_s6 + $0x7d8] sm:$0xff] }
 0x31c   :  { %2198 = vmatmul.mubr.msk.f32.vlgmr.msra.gmra.mrb[6].mxu1 %vm846_vm1, %v1081_v51  ;;  %v1653_v58 = vld [vmem:[%s4577_s6 + $0x540] sm:$0xff] }
 0x31d   :  { %2622 = vmatpush1.bf16.msra.mxu1 %v2621_v61  ;;  %1365 = vmatprep.mubr.f32.mxu1 %v3024_v44  ;;  %v1575_v61 = vld [vmem:[%s4577_s6 + $0x2d0] sm:$0xff] }
 0x31e   :  { %2624 = vmatprep.subr.bf16.mxu1 %v2623_v62  ;;  %v1574_v62 = vld [vmem:[%s4577_s6 + $0x2c8] sm:$0xff]  ;;  %v2721_v63 = vpack.c.bf16 %v1575_v61, %v1567_v56  ;;  %2720 = vmatprep.subr.bf16.mxu0 %v2719_v60  ;;  %v1647_v56 = vld [vmem:[%s4577_s6 + $0x510] sm:$0xff] }
 0x31f   :  { %v2655_v0 = vpack.c.bf16 %v1574_v62, %v1566_v59  ;;  %v1655_v61 = vld [vmem:[%s4577_s6 + $0x550] sm:$0xff]  ;;  %v1662_v62 = vld [vmem:[%s4577_s6 + $0x588] sm:$0xff] }
 0x320   :  { %2722 = vmatpush1.bf16.msra.mxu0 %v2721_v63  ;;  %v1670_v63 = vld [vmem:[%s4577_s6 + $0x5c8] sm:$0xff] }
 0x321   :  { %2626 = vmatpush1.bf16.msra.mxu1 %v2625_v3  ;;  %v2657_v3 = vpack.c.bf16 %v1573_v2, %v1565_v1  ;;  %2724 = vmatprep.subr.bf16.mxu0 %v2723_v11  ;;  %v1672_v1 = vld [vmem:[%s4577_s6 + $0x5d8] sm:$0xff]  ;;  %v2677_v2 = vpack.c.bf16 %v1653_v58, %v1645_v55  ;;  %v2679_v6 = vpack.c.bf16 %v1670_v63, %v1662_v62  ;;  %v1686_v11 = vld [vmem:[%s4577_s6 + $0x648] sm:$0xff]  ;;  %v1727_v55 = vld [vmem:[%s4577_s6 + $0x790] sm:$0xff] }
 0x322   :  { %2628 = vmatprep.subr.bf16.mxu1 %v2627_v4  ;;  %v1582_v4 = vld [vmem:[%s4577_s6 + $0x308] sm:$0xff]  ;;  %v1735_v58 = vld [vmem:[%s4577_s6 + $0x7d0] sm:$0xff]  ;;  %v1492_v62 = vld [vmem:[%s4577_s6 + $0x38] sm:$0xff] }
 0x323   :  { %v2659_v7 = vpack.c.bf16 %v1590_v5, %v1582_v4  ;;  %v1661_v4 = vld [vmem:[%s4577_s6 + $0x580] sm:$0xff] }
 0x324   :  { %2199 = vmatmul.mubr.msk.f32.vlgmr.msra.gmra.mrb[8].mxu1 %vm846_vm1, %v1081_v51  ;;  %v1669_v5 = vld [vmem:[%s4577_s6 + $0x5c0] sm:$0xff] }
 0x325   :  { %2630 = vmatpush1.bf16.msra.mxu1 %v2629_v9  ;;  %1436 = vmatprep.mubr.f32.mxu1 %v3024_v44  ;;  %v1493_v44 = vld [vmem:[%s4577_s6 + $0x40] sm:$0xff] }
 0x326   :  { %2632 = vmatprep.subr.bf16.mxu1 %v2631_v10  ;;  %v2637_v18 = vpack.c.bf16 %v1493_v44, %v1485_v17  ;;  %v1581_v9 = vld [vmem:[%s4577_s6 + $0x300] sm:$0xff]  ;;  %v1606_v17 = vld [vmem:[%s4577_s6 + $0x3c8] sm:$0xff]  ;;  %v1600_v44 = vld [vmem:[%s4577_s6 + $0x398] sm:$0xff] }
 0x327   :  { %v1589_v10 = vld [vmem:[%s4577_s6 + $0x340] sm:$0xff]  ;;  %v2727_v22 = vpack.c.bf16 %v1608_v19, %v1600_v44  ;;  %v1679_v19 = vld [vmem:[%s4577_s6 + $0x610] sm:$0xff] }
 0x328   :  { %v2661_v12 = vpack.c.bf16 %v1589_v10, %v1581_v9  ;;  %v1671_v9 = vld [vmem:[%s4577_s6 + $0x5d0] sm:$0xff]  ;;  %v1678_v10 = vld [vmem:[%s4577_s6 + $0x608] sm:$0xff] }
 0x329   :  { %2634 = vmatpush1.bf16.msra.mxu1 %v2633_v13  ;;  %v1583_v13 = vld [vmem:[%s4577_s6 + $0x310] sm:$0xff]  ;;  %v2683_v44 = vpack.c.bf16 %v1686_v11, %v1678_v10 }
 0x32a   :  { %2636 = vmatprep.subr.bf16.mxu1 %v2635_v16  ;;  %v2725_v15 = vpack.c.bf16 %v1591_v14, %v1583_v13  ;;  %v1598_v16 = vld [vmem:[%s4577_s6 + $0x388] sm:$0xff]  ;;  %v1688_v13 = vld [vmem:[%s4577_s6 + $0x658] sm:$0xff]  ;;  %v2681_v14 = vpack.c.bf16 %v1669_v5, %v1661_v4  ;;  %v1114_v5 = vld [vmem:[%s4578_s7] sm:$0xff] }
 0x32c   :  { %2200 = vmatmul.mubr.msk.f32.vlgmr.msra.gmra.mrb[10].mxu1 %vm846_vm1, %v1081_v51  ;;  %v2651_v51 = vpack.c.bf16 %v1558_v49, %v1550_v45  ;;  %2726 = vmatpush1.bf16.msra.mxu0 %v2725_v15  ;;  %v1646_v49 = vld [vmem:[%s4577_s6 + $0x508] sm:$0xff]  ;;  %v2745_v15 = vpack.c.bf16 %v1671_v9, %v1663_v8 }
 0x32d   :  { %2638 = vmatpush1.bf16.msra.mxu1 %v2637_v18  ;;  %v2663_v18 = vpack.c.bf16 %v1606_v17, %v1598_v16  ;;  %2728 = vmatprep.subr.bf16.mxu0 %v2727_v22  ;;  %v2675_v59 = vpack.c.bf16 %v1654_v50, %v1646_v49  ;;  %v1677_v16 = vld [vmem:[%s4577_s6 + $0x600] sm:$0xff]  ;;  %v1702_v22 = vld [vmem:[%s4577_s6 + $0x6c8] sm:$0xff] }
 0x32e   :  { %2640 = vmatprep.subr.bf16.mxu1 %v2639_v21  ;;  %v1605_v21 = vld [vmem:[%s4577_s6 + $0x3c0] sm:$0xff] }
 0x32f   :  { %v2665_v23 = vpack.c.bf16 %v1605_v21, %v1597_v20  ;;  %v1685_v17 = vld [vmem:[%s4577_s6 + $0x640] sm:$0xff]  ;;  %v1687_v20 = vld [vmem:[%s4577_s6 + $0x650] sm:$0xff]  ;;  %v1694_v21 = vld [vmem:[%s4577_s6 + $0x688] sm:$0xff] }
 0x330   :  { %v2749_v26 = vpack.c.bf16 %v1687_v20, %v1679_v19 }
 0x331   :  { %2642 = vmatpush1.bf16.msra.mxu1 %v2641_v24  ;;  %v1599_v24 = vld [vmem:[%s4577_s6 + $0x390] sm:$0xff] }
 0x332   :  { %2644 = vmatprep.subr.bf16.mxu1 %v2643_v27  ;;  %v2729_v27 = vpack.c.bf16 %v1607_v25, %v1599_v24  ;;  %v1704_v24 = vld [vmem:[%s4577_s6 + $0x6d8] sm:$0xff]  ;;  %v2685_v25 = vpack.c.bf16 %v1685_v17, %v1677_v16 }
 0x334   :  { %2730 = vmatpush1.bf16.msra.mxu0 %v2729_v27  ;;  %v1693_v27 = vld [vmem:[%s4577_s6 + $0x680] sm:$0xff] }
 0x335   :  { %2646 = vmatpush1.bf16.msra.mxu1 %v2645_v30  ;;  %v1624_v30 = vld [vmem:[%s4577_s6 + $0x458] sm:$0xff]  ;;  %v2689_v36 = vpack.c.bf16 %v1701_v28, %v1693_v27 }
 0x336   :  { %2648 = vmatprep.subr.bf16.mxu1 %v2647_v38  ;;  %v2731_v57 = vpack.c.bf16 %v1624_v30, %v1616_v29  ;;  %v1638_v38 = vld [vmem:[%s4577_s6 + $0x4c8] sm:$0xff]  ;;  %v2687_v29 = vpack.c.bf16 %v1702_v22, %v1694_v21 }
 0x337   :  { %v2671_v40 = vpack.c.bf16 %v1638_v38, %v1630_v37  ;;  %v1709_v38 = vld [vmem:[%s4577_s6 + $0x700] sm:$0xff] }
 0x338   :  { %2732 = vmatprep.subr.bf16.mxu0 %v2731_v57  ;;  %v1703_v57 = vld [vmem:[%s4577_s6 + $0x6d0] sm:$0xff] }
 0x339   :  { %2650 = vmatpush1.bf16.msra.mxu1 %v2649_v41  ;;  %v1632_v41 = vld [vmem:[%s4577_s6 + $0x498] sm:$0xff]  ;;  %2734 = vmatpush1.bf16.msra.mxu0 %v2733_v39  ;;  %v1717_v39 = vld [vmem:[%s4577_s6 + $0x740] sm:$0xff] }
 0x33a   :  { %2652 = vmatprep.subr.bf16.mxu1 %v2651_v51  ;;  %v2735_v45 = vpack.c.bf16 %v1640_v42, %v1632_v41  ;;  %v1648_v51 = vld [vmem:[%s4577_s6 + $0x518] sm:$0xff]  ;;  %v1711_v42 = vld [vmem:[%s4577_s6 + $0x710] sm:$0xff]  ;;  %v2693_v49 = vpack.c.bf16 %v1717_v39, %v1709_v38 }
 0x33b   :  { %v2757_v50 = vpack.c.bf16 %v1719_v43, %v1711_v42 }
 0x33c   :  { %2736 = vmatprep.subr.bf16.mxu0 %v2735_v45  ;;  %v1726_v45 = vld [vmem:[%s4577_s6 + $0x788] sm:$0xff] }
 0x33d   :  { %2654 = vmatpush1.bf16.msra.mxu1 %v2653_v54  ;;  %v1656_v54 = vld [vmem:[%s4577_s6 + $0x558] sm:$0xff]  ;;  %2738 = vmatpush1.bf16.msra.mxu0 %v2737_v53  ;;  %v2759_v53 = vpack.c.bf16 %v1736_v48, %v1728_v47 }
 0x33e   :  { %2656 = vmatprep.subr.bf16.mxu1 %v2655_v0  ;;  %v2739_v60 = vpack.c.bf16 %v1656_v54, %v1648_v51  ;;  %v1664_v0 = vld [vmem:[%s4577_s6 + $0x598] sm:$0xff]  ;;  %v1725_v51 = vld [vmem:[%s4577_s6 + $0x780] sm:$0xff] }
 0x33f   :  { %v1733_v54 = vld [vmem:[%s4577_s6 + $0x7c0] sm:$0xff] }
 0x340   :  { %2740 = vmatprep.subr.bf16.mxu0 %v2739_v60  ;;  %v2761_v60 = vpack.c.bf16 %v1735_v58, %v1727_v55  ;;  %v1497_v55 = vld [vmem:[%s4577_s6 + $0x60] sm:$0xff]  ;;  %v1491_v58 = vld [vmem:[%s4577_s6 + $0x30] sm:$0xff] }
 0x341   :  { %2658 = vmatpush1.bf16.msra.mxu1 %v2657_v3  ;;  %v2741_v3 = vpack.c.bf16 %v1655_v61, %v1647_v56  ;;  %v1490_v56 = vld [vmem:[%s4577_s6 + $0x28] sm:$0xff] }
 0x342   :  { %2660 = vmatprep.subr.bf16.mxu1 %v2659_v7  ;;  %v2743_v7 = vpack.c.bf16 %v1672_v1, %v1664_v0  ;;  %v1498_v61 = vld [vmem:[%s4577_s6 + $0x68] sm:$0xff]  ;;  %v1500_v0 = vld [vmem:[%s4577_s6 + $0x78] sm:$0xff] }
 0x343   :  { %2742 = vmatpush1.bf16.msra.mxu0 %v2741_v3  ;;  %v2763_v63 = vpack.c.bf16 %v1498_v61, %v1490_v56  ;;  %v2827_v1 = vpack.c.bf16 %v1500_v0, %v1492_v62  ;;  %v1506_v56 = vld [vmem:[%s4577_s6 + $0xa8] sm:$0xff]  ;;  %v1508_v62 = vld [vmem:[%s4577_s6 + $0xb8] sm:$0xff] }
 0x344   :  { %2744 = vmatprep.subr.bf16.mxu0 %v2743_v7  ;;  %v1514_v61 = vld [vmem:[%s4577_s6 + $0xe8] sm:$0xff] }
 0x345   :  { %2662 = vmatpush1.bf16.msra.mxu1 %v2661_v12  ;;  %v1680_v12 = vld [vmem:[%s4577_s6 + $0x618] sm:$0xff] }
 0x346   :  { %2664 = vmatprep.subr.bf16.mxu1 %v2663_v18  ;;  %v2747_v18 = vpack.c.bf16 %v1688_v13, %v1680_v12 }
 0x347   :  { %2746 = vmatpush1.bf16.msra.mxu0 %v2745_v15 }
 0x348   :  { %2748 = vmatprep.subr.bf16.mxu0 %v2747_v18 }
 0x349   :  { %2666 = vmatpush1.bf16.msra.mxu1 %v2665_v23  ;;  %v1696_v23 = vld [vmem:[%s4577_s6 + $0x698] sm:$0xff] }
 0x34a   :  { %2668 = vmatprep.subr.bf16.mxu1 %v2667_v31  ;;  %v2751_v30 = vpack.c.bf16 %v1704_v24, %v1696_v23  ;;  %v1695_v31 = vld [vmem:[%s4577_s6 + $0x690] sm:$0xff] }
 0x34b   :  { %2750 = vmatpush1.bf16.msra.mxu0 %v2749_v26  ;;  %v2753_v37 = vpack.c.bf16 %v1703_v57, %v1695_v31 }
 0x34c   :  { %2752 = vmatprep.subr.bf16.mxu0 %v2751_v30 }
 0x34d   :  { %2670 = vmatpush1.bf16.msra.mxu1 %v2669_v35  ;;  %v1720_v35 = vld [vmem:[%s4577_s6 + $0x758] sm:$0xff] }
 0x34e   :  { %2672 = vmatprep.subr.bf16.mxu1 %v2671_v40  ;;  %v2691_v40 = vpack.c.bf16 %v1718_v33, %v1710_v32  ;;  %v2755_v41 = vpack.c.bf16 %v1720_v35, %v1712_v34 }
 0x34f   :  { %2754 = vmatpush1.bf16.msra.mxu0 %v2753_v37 }
 0x350   :  { %2756 = vmatprep.subr.bf16.mxu0 %v2755_v41 }
 0x351   :  { %2674 = vmatpush1.bf16.msra.mxu1 %v2673_v52  ;;  %v2695_v52 = vpack.c.bf16 %v1734_v46, %v1726_v45 }
 0x352   :  { %2676 = vmatprep.subr.bf16.mxu1 %v2675_v59  ;;  %v2697_v59 = vpack.c.bf16 %v1733_v54, %v1725_v51 }
 0x353   :  { %2758 = vmatpush1.bf16.msra.mxu0 %v2757_v50 }
 0x354   :  { %2760 = vmatprep.subr.bf16.mxu0 %v2759_v53  ;;  %v1489_v53 = vld [vmem:[%s4577_s6 + $0x20] sm:$0xff] }
 0x355   :  { %2678 = vmatpush1.bf16.msra.mxu1 %v2677_v2  ;;  %v1116_v2 = vlaneseq }
 0x356   :  { %2680 = vmatprep.subr.bf16.mxu1 %v2679_v6 }
 0x357   :  { %2762 = vmatpush1.bf16.msra.mxu0 %v2761_v60  ;;  %v1117_v3 = vshrl.u32 %v1116_v2, 7 }
 0x358   :  { %2828 = vmatprep.subr.bf16.mxu0 %v2827_v1  ;;  %v2765_v1 = vpack.c.bf16 %v1497_v55, %v1489_v53  ;;  %v1571_v55 = vld [vmem:[%s4577_s6 + $0x2b0] sm:$0xff] }
 0x359   :  { %2682 = vmatpush1.bf16.msra.mxu1 %v2681_v14  ;;  %v1118_v4 = vsub.s32 0, %v1117_v3  ;;  %v1122_v6 = vsub.s32 1, %v1117_v3  ;;  %v1126_v12 = vsub.s32 2, %v1117_v3  ;;  %v1130_v14 = vsub.s32 3, %v1117_v3 }
 0x35a   :  { %2684 = vmatprep.subr.bf16.mxu1 %v2683_v44  ;;  %v1134_v20 = vsub.s32 4, %v1117_v3  ;;  %v1138_v22 = vsub.s32 5, %v1117_v3  ;;  %v1142_v31 = vsub.s32 6, %v1117_v3  ;;  %v1146_v32 = vsub.s32 7, %v1117_v3  ;;  %v1505_v3 = vld [vmem:[%s4577_s6 + $0xa0] sm:$0xff] }
 0x35b   :  { %v1119_v7 = vrot.slane %v1114_v5, %v1118_v4  ;;  %v1123_v8 = vrot.slane %v1114_v5, %v1122_v6  ;;  %v1127_v16 = vrot.slane %v1114_v5, %v1126_v12  ;;  %v1131_v17 = vrot.slane %v1114_v5, %v1130_v14  ;;  %v1513_v4 = vld [vmem:[%s4577_s6 + $0xe0] sm:$0xff]  ;;  %v1515_v6 = vld [vmem:[%s4577_s6 + $0xf0] sm:$0xff]  ;;  %v1532_v12 = vld [vmem:[%s4577_s6 + $0x178] sm:$0xff] }
 0x35c   :  { %v1139_v27 = vrot.slane %v1114_v5, %v1138_v22  ;;  %v1143_v34 = vrot.slane %v1114_v5, %v1142_v31  ;;  %v1147_v35 = vrot.slane %v1114_v5, %v1146_v32  ;;  %v1540_v22 = vld [vmem:[%s4577_s6 + $0x1b8] sm:$0xff]  ;;  %v1547_v31 = vld [vmem:[%s4577_s6 + $0x1f0] sm:$0xff]  ;;  %v1562_v32 = vld [vmem:[%s4577_s6 + $0x268] sm:$0xff] }
 0x35d   :  { %2686 = vmatpush1.bf16.msra.mxu1 %v2685_v25  ;;  %v1135_v25 = vrot.slane %v1114_v5, %v1134_v20  ;;  %v1507_v5 = vld [vmem:[%s4577_s6 + $0xb0] sm:$0xff]  ;;  %v1538_v20 = vld [vmem:[%s4577_s6 + $0x1a8] sm:$0xff] }
 0x35e   :  { %2688 = vmatprep.subr.bf16.mxu1 %v2687_v29  ;;  %v2833_v14 = vpack.c.bf16 %v1515_v6, %v1507_v5  ;;  %v1587_v5 = vld [vmem:[%s4577_s6 + $0x330] sm:$0xff] }
 0x35f   :  { %v1595_v6 = vld [vmem:[%s4577_s6 + $0x370] sm:$0xff] }
 0x361   :  { %2690 = vmatpush1.bf16.msra.mxu1 %v2689_v36 }
 0x362   :  { %2692 = vmatprep.subr.bf16.mxu1 %v2691_v40 }
 0x365   :  { %2694 = vmatpush1.bf16.msra.mxu1 %v2693_v49 }
 0x366   :  { %2696 = vmatprep.subr.bf16.mxu1 %v2695_v52 }
 0x369   :  { %2698 = vmatpush1.bf16.msra.mxu1 %v2697_v59  ;;  %v1499_v59 = vld [vmem:[%s4577_s6 + $0x70] sm:$0xff] }
 0x36a   :  { %2764 = vmatprep.subr.bf16.mxu1 %v2763_v63  ;;  %v1516_v63 = vld [vmem:[%s4577_s6 + $0xf8] sm:$0xff]  ;;  %v2829_v2 = vpack.c.bf16 %v1499_v59, %v1491_v58  ;;  %v1579_v58 = vld [vmem:[%s4577_s6 + $0x2f0] sm:$0xff]  ;;  %v1586_v59 = vld [vmem:[%s4577_s6 + $0x328] sm:$0xff] }
 0x3e7   :  { %v1225_v9 = vpop.f32.mrb[4].mxu1 }
 0x3e8   :  { %v1226_v10 = vadd.f32 %v1225_v9, %v1119_v7  ;;  %v1227_v11 = vpop.f32.mrb[5].mxu1  ;;  %v1522_v7 = vld [vmem:[%s4577_s6 + $0x128] sm:$0xff]  ;;  %v2831_v9 = vpack.c.bf16 %v1516_v63, %v1508_v62  ;;  %v1596_v62 = vld [vmem:[%s4577_s6 + $0x378] sm:$0xff] }
 0x3e9   :  { %v1228_v13 = vadd.f32 %v1227_v11, %v1123_v8  ;;  %v2767_v8 = vpack.c.bf16 %v1514_v61, %v1506_v56  ;;  %v1524_v11 = vld [vmem:[%s4577_s6 + $0x138] sm:$0xff]  ;;  %v1594_v56 = vld [vmem:[%s4577_s6 + $0x368] sm:$0xff] }
 0x3ea   :  { %v1588_v61 = vld [vmem:[%s4577_s6 + $0x338] sm:$0xff] }
 0x3eb   :  { %v1451_v15 = vcombine.low %v1226_v10, %v1228_v13  ;;  %v1530_v10 = vld [vmem:[%s4577_s6 + $0x168] sm:$0xff]  ;;  %v2769_v13 = vpack.c.bf16 %v1513_v4, %v1505_v3  ;;  %v2787_v3 = vpack.c.bf16 %v1594_v56, %v1586_v59  ;;  %v2851_v4 = vpack.c.bf16 %v1596_v62, %v1588_v61  ;;  %v1668_v59 = vld [vmem:[%s4577_s6 + $0x5b8] sm:$0xff] }
 0x3ec   :  { %v1676_v56 = vld [vmem:[%s4577_s6 + $0x5f8] sm:$0xff] }
 0x3ed   :  { %1459 = vst [vmem:[#allocation6] sm:$0xff] %v1451_v15  ;;  %v1521_v15 = vld [vmem:[%s4577_s6 + $0x120] sm:$0xff] }
 0x3ef   :  { %v1296_v44 = vpop.f32.mrb[6].mxu1 }
 0x3f0   :  { %v1297_v18 = vadd.f32 %v1296_v44, %v1127_v16  ;;  %v1298_v19 = vpop.f32.mrb[7].mxu1  ;;  %v1529_v16 = vld [vmem:[%s4577_s6 + $0x160] sm:$0xff]  ;;  %v2835_v44 = vpack.c.bf16 %v1532_v12, %v1524_v11  ;;  %v2853_v12 = vpack.c.bf16 %v1595_v6, %v1587_v5  ;;  %v1682_v5 = vld [vmem:[%s4577_s6 + $0x628] sm:$0xff] }
 0x3f1   :  { %v1299_v21 = vadd.f32 %v1298_v19, %v1131_v17  ;;  %v2771_v17 = vpack.c.bf16 %v1530_v10, %v1522_v7  ;;  %v1531_v19 = vld [vmem:[%s4577_s6 + $0x170] sm:$0xff]  ;;  %v1602_v7 = vld [vmem:[%s4577_s6 + $0x3a8] sm:$0xff]  ;;  %v1612_v10 = vld [vmem:[%s4577_s6 + $0x3f8] sm:$0xff] }
 0x3f2   :  { %v1690_v6 = vld [vmem:[%s4577_s6 + $0x668] sm:$0xff] }
 0x3f3   :  { %v1452_v23 = vcombine.low %v1297_v18, %v1299_v21  ;;  %v1523_v18 = vld [vmem:[%s4577_s6 + $0x130] sm:$0xff]  ;;  %v1546_v21 = vld [vmem:[%s4577_s6 + $0x1e8] sm:$0xff] }
 0x3f4   :  { %v1463_v24 = vld [vmem:[#allocation6] sm:$0x33] }
 0x3f5   :  { %v2201_v26 = vmul.f32 -1.442695, %v1463_v24  ;;  %1460 = vst [vmem:[#allocation6 + $0x8] sm:$0xff] %v1452_v23  ;;  %v1548_v23 = vld [vmem:[%s4577_s6 + $0x1f8] sm:$0xff]  ;;  %v2773_v24 = vpack.c.bf16 %v1529_v16, %v1521_v15 }
 0x3f7   :  { %v1367_v28 = vpop.f32.mrb[8].mxu1  ;;  %2969 = vpow2.f32 %v2201_v26  ;;  %v1537_v26 = vld [vmem:[%s4577_s6 + $0x1a0] sm:$0xff] }
 0x3f8   :  { %v1368_v29 = vadd.f32 %v1367_v28, %v1135_v25  ;;  %v1369_v30 = vpop.f32.mrb[9].mxu1  ;;  %v2837_v25 = vpack.c.bf16 %v1531_v19, %v1523_v18  ;;  %v2775_v28 = vpack.c.bf16 %v1546_v21, %v1538_v20  ;;  %v1618_v18 = vld [vmem:[%s4577_s6 + $0x428] sm:$0xff]  ;;  %v1620_v20 = vld [vmem:[%s4577_s6 + $0x438] sm:$0xff] }
 0x3f9   :  { %v1370_v57 = vadd.f32 %v1369_v30, %v1139_v27  ;;  %v1545_v27 = vld [vmem:[%s4577_s6 + $0x1e0] sm:$0xff]  ;;  %v1539_v30 = vld [vmem:[%s4577_s6 + $0x1b0] sm:$0xff]  ;;  %v1626_v19 = vld [vmem:[%s4577_s6 + $0x468] sm:$0xff] }
 0x3fa   :  { %v1628_v21 = vld [vmem:[%s4577_s6 + $0x478] sm:$0xff] }
 0x3fb   :  { %v1453_v33 = vcombine.low %v1368_v29, %v1370_v57  ;;  %v2839_v29 = vpack.c.bf16 %v1548_v23, %v1540_v22  ;;  %v1554_v57 = vld [vmem:[%s4577_s6 + $0x228] sm:$0xff] }
 0x3fd   :  { %1461 = vst [vmem:[#allocation6 + $0x10] sm:$0xff] %v1453_v33  ;;  %v1556_v33 = vld [vmem:[%s4577_s6 + $0x238] sm:$0xff] }
 0x3ff   :  { %v1438_v36 = vpop.f32.mrb[10].mxu1 }
 0x400   :  { %v1439_v37 = vadd.f32 %v1438_v36, %v1143_v34  ;;  %v1440_v38 = vpop.f32.mrb[11].mxu1  ;;  %v1564_v34 = vld [vmem:[%s4577_s6 + $0x278] sm:$0xff]  ;;  %v2841_v36 = vpack.c.bf16 %v1547_v31, %v1539_v30  ;;  %v1634_v30 = vld [vmem:[%s4577_s6 + $0x4a8] sm:$0xff] }
 0x401   :  { %v1441_v39 = vadd.f32 %v1440_v38, %v1147_v35  ;;  %v2970_v40 = vpop.eup %2969  ;;  %v2777_v35 = vpack.c.bf16 %v1545_v27, %v1537_v26  ;;  %v1561_v38 = vld [vmem:[%s4577_s6 + $0x260] sm:$0xff]  ;;  %v2795_v26 = vpack.c.bf16 %v1626_v19, %v1618_v18  ;;  %v2859_v27 = vpack.c.bf16 %v1628_v21, %v1620_v20  ;;  %v1642_v31 = vld [vmem:[%s4577_s6 + $0x4e8] sm:$0xff]  ;;  %v1700_v18 = vld [vmem:[%s4577_s6 + $0x6b8] sm:$0xff] }
 0x402   :  { %v1469_v42 = vadd.f32 1.0, %v2970_v40  ;;  %v2843_v40 = vpack.c.bf16 %v1564_v34, %v1556_v33  ;;  %v1708_v19 = vld [vmem:[%s4577_s6 + $0x6f8] sm:$0xff] }
 0x403   :  { %v1454_v41 = vcombine.low %v1439_v37, %v1441_v39  ;;  %v1553_v37 = vld [vmem:[%s4577_s6 + $0x220] sm:$0xff]  ;;  %v2779_v39 = vpack.c.bf16 %v1562_v32, %v1554_v57  ;;  %v1636_v57 = vld [vmem:[%s4577_s6 + $0x4b8] sm:$0xff] }
 0x404   :  { %v1464_v43 = vld [vmem:[#allocation6 + $0x10] sm:$0x33]  ;;  %2971 = vrcp.f32 %v1469_v42  ;;  %v1563_v42 = vld [vmem:[%s4577_s6 + $0x270] sm:$0xff]  ;;  %v1644_v32 = vld [vmem:[%s4577_s6 + $0x4f8] sm:$0xff] }
 0x405   :  { %1462 = vst [vmem:[#allocation6 + $0x18] sm:$0xff] %v1454_v41  ;;  %2973 = vtanh.f32 %v1464_v43  ;;  %v1555_v41 = vld [vmem:[%s4577_s6 + $0x230] sm:$0xff]  ;;  %v1570_v43 = vld [vmem:[%s4577_s6 + $0x2a8] sm:$0xff] }
 0x40c   :  { %v1465_v45 = vld [vmem:[#allocation6 + $0x18] sm:$0x33] }
 0x40d   :  { %v2202_v46 = vmul.f32 -1.442695, %v1465_v45  ;;  %v1578_v45 = vld [vmem:[%s4577_s6 + $0x2e8] sm:$0xff] }
 0x40e   :  { %v2972_v47 = vpop.eup %2971  ;;  %v2783_v53 = vpack.c.bf16 %v1578_v45, %v1570_v43  ;;  %v1652_v43 = vld [vmem:[%s4577_s6 + $0x538] sm:$0xff] }
 0x40f   :  { %2975 = vpow2.f32 %v2202_v46  ;;  %v2974_v48 = vpop.eup %2973  ;;  %v1572_v46 = vld [vmem:[%s4577_s6 + $0x2b8] sm:$0xff] }
 0x410   :  { %v4076_v49 = vmul.f32 %v2974_v48, %v2972_v47  ;;  %v1580_v47 = vld [vmem:[%s4577_s6 + $0x2f8] sm:$0xff]  ;;  %v2781_v48 = vpack.c.bf16 %v1561_v38, %v1553_v37  ;;  %v2799_v37 = vpack.c.bf16 %v1642_v31, %v1634_v30  ;;  %v2863_v38 = vpack.c.bf16 %v1644_v32, %v1636_v57 }
 0x411   :  { %v1660_v45 = vld [vmem:[%s4577_s6 + $0x578] sm:$0xff] }
 0x412   :  { %2977 = vtanh.f32 %v4076_v49  ;;  %v1716_v30 = vld [vmem:[%s4577_s6 + $0x738] sm:$0xff] }
 0x413   :  { %v1724_v31 = vld [vmem:[%s4577_s6 + $0x778] sm:$0xff] }
 0x419   :  { %v2976_v50 = vpop.eup %2975 }
 0x41a   :  { %v1477_v51 = vadd.f32 1.0, %v2976_v50  ;;  %v2845_v50 = vpack.c.bf16 %v1563_v42, %v1555_v41  ;;  %v1650_v41 = vld [vmem:[%s4577_s6 + $0x528] sm:$0xff] }
 0x41b   :  { %v1658_v42 = vld [vmem:[%s4577_s6 + $0x568] sm:$0xff] }
 0x41c   :  { %2979 = vrcp.f32 %v1477_v51  ;;  %v2978_v52 = vpop.eup %2977  ;;  %v1569_v51 = vld [vmem:[%s4577_s6 + $0x2a0] sm:$0xff] }
 0x426   :  { %v2980_v54 = vpop.eup %2979 }
 0x427   :  { %v4091_v60 = vmul.f32 %v2980_v54, %v2978_v52  ;;  %v1577_v52 = vld [vmem:[%s4577_s6 + $0x2e0] sm:$0xff]  ;;  %v2847_v54 = vpack.c.bf16 %v1580_v47, %v1572_v46 }
 0x428   :  { %v2785_v63 = vpack.c.bf16 %v1577_v52, %v1569_v51  ;;  %v2803_v51 = vpack.c.bf16 %v1658_v42, %v1650_v41  ;;  %v2867_v52 = vpack.c.bf16 %v1660_v45, %v1652_v43  ;;  %v1732_v41 = vld [vmem:[%s4577_s6 + $0x7b8] sm:$0xff] }
 0x429   :  { %v1742_v0 = vcombine.high %v4091_v60, %v4091_v60  ;;  %v1740_v42 = vld [vmem:[%s4577_s6 + $0x7f8] sm:$0xff] }
 0x42b   :  { %1808 = vmatprep.mubr.f32.mxu1 %v1742_v0  ;;  %1879 = vmatprep.mubr.f32.mxu0 %v1742_v0 }
 0x42c   :  { %1809 = vmatmul.mubr.f32.vlgmr.msra.gmra.mrb[12].mxu1 %v4091_v60  ;;  %1880 = vmatmul.mubr.f32.vlgmr.msra.gmra.mrb[70].mxu0 %v4091_v60 }
 0x42d   :  { %2766 = vmatpush1.bf16.msra.mxu1 %v2765_v1  ;;  %2830 = vmatpush1.bf16.msra.mxu0 %v2829_v2  ;;  %v1585_v1 = vld [vmem:[%s4577_s6 + $0x320] sm:$0xff] }
 0x42e   :  { %1950 = vmatprep.mubr.f32.mxu1 %v1742_v0  ;;  %2021 = vmatprep.mubr.f32.mxu0 %v1742_v0  ;;  %v2849_v0 = vpack.c.bf16 %v1579_v58, %v1571_v55  ;;  %v1593_v2 = vld [vmem:[%s4577_s6 + $0x360] sm:$0xff]  ;;  %v1666_v55 = vld [vmem:[%s4577_s6 + $0x5a8] sm:$0xff] }
 0x42f   :  { %2768 = vmatprep.subr.bf16.mxu1 %v2767_v8  ;;  %2832 = vmatprep.subr.bf16.mxu0 %v2831_v9  ;;  %v1610_v8 = vld [vmem:[%s4577_s6 + $0x3e8] sm:$0xff]  ;;  %v1604_v9 = vld [vmem:[%s4577_s6 + $0x3b8] sm:$0xff]  ;;  %v2789_v11 = vpack.c.bf16 %v1593_v2, %v1585_v1  ;;  %v2871_v2 = vpack.c.bf16 %v1676_v56, %v1668_v59  ;;  %v2063_v59 = vld [vmem:[%s4579_s8] sm:$0xff] }
 0x430   :  { %v2791_v15 = vpack.c.bf16 %v1610_v8, %v1602_v7  ;;  %v2855_v16 = vpack.c.bf16 %v1612_v10, %v1604_v9  ;;  %v1674_v58 = vld [vmem:[%s4577_s6 + $0x5e8] sm:$0xff]  ;;  %v1684_v7 = vld [vmem:[%s4577_s6 + $0x638] sm:$0xff] }
 0x431   :  { %2770 = vmatpush1.bf16.msra.mxu1 %v2769_v13  ;;  %2834 = vmatpush1.bf16.msra.mxu0 %v2833_v14  ;;  %v1601_v13 = vld [vmem:[%s4577_s6 + $0x3a0] sm:$0xff]  ;;  %v2807_v1 = vpack.c.bf16 %v1674_v58, %v1666_v55  ;;  %v1692_v8 = vld [vmem:[%s4577_s6 + $0x678] sm:$0xff]  ;;  %v2080_v58 = vld [vmem:[%s4579_s8 + $0x88] sm:$0xff] }
 0x432   :  { %2772 = vmatprep.subr.bf16.mxu1 %v2771_v17  ;;  %2836 = vmatprep.subr.bf16.mxu0 %v2835_v44  ;;  %v1609_v14 = vld [vmem:[%s4577_s6 + $0x3e0] sm:$0xff]  ;;  %v1603_v17 = vld [vmem:[%s4577_s6 + $0x3b0] sm:$0xff] }
 0x433   :  { %v1611_v44 = vld [vmem:[%s4577_s6 + $0x3f0] sm:$0xff]  ;;  %v2793_v22 = vpack.c.bf16 %v1609_v14, %v1601_v13  ;;  %v2811_v13 = vpack.c.bf16 %v1690_v6, %v1682_v5  ;;  %v2875_v14 = vpack.c.bf16 %v1692_v8, %v1684_v7  ;;  %v2079_v55 = vld [vmem:[%s4579_s8 + $0x80] sm:$0xff]  ;;  %v2084_v5 = vld [vmem:[%s4579_s8 + $0xa8] sm:$0xff] }
 0x434   :  { %v2857_v23 = vpack.c.bf16 %v1611_v44, %v1603_v17  ;;  %v1698_v17 = vld [vmem:[%s4577_s6 + $0x6a8] sm:$0xff]  ;;  %v2891_v56 = vpack.c.bf16 %v2080_v58, %v2079_v55  ;;  %v2067_v7 = vld [vmem:[%s4579_s8 + $0x20] sm:$0xff]  ;;  %v1482_v58 = vld [vmem:[#allocation6] sm:$0xcc] }
 0x435   :  { %2774 = vmatpush1.bf16.msra.mxu1 %v2773_v24  ;;  %2838 = vmatpush1.bf16.msra.mxu0 %v2837_v25  ;;  %v1617_v24 = vld [vmem:[%s4577_s6 + $0x420] sm:$0xff]  ;;  %v1706_v44 = vld [vmem:[%s4577_s6 + $0x6e8] sm:$0xff] }
 0x436   :  { %2776 = vmatprep.subr.bf16.mxu1 %v2775_v28  ;;  %2840 = vmatprep.subr.bf16.mxu0 %v2839_v29  ;;  %v1625_v25 = vld [vmem:[%s4577_s6 + $0x460] sm:$0xff]  ;;  %v1619_v28 = vld [vmem:[%s4577_s6 + $0x430] sm:$0xff]  ;;  %v2068_v8 = vld [vmem:[%s4579_s8 + $0x28] sm:$0xff] }
 0x437   :  { %v1627_v29 = vld [vmem:[%s4577_s6 + $0x470] sm:$0xff]  ;;  %v2797_v33 = vpack.c.bf16 %v1625_v25, %v1617_v24  ;;  %v2815_v24 = vpack.c.bf16 %v1706_v44, %v1698_v17  ;;  %v2879_v25 = vpack.c.bf16 %v1708_v19, %v1700_v18  ;;  %v2088_v17 = vld [vmem:[%s4579_s8 + $0xc8] sm:$0xff]  ;;  %v2071_v44 = vld [vmem:[%s4579_s8 + $0x40] sm:$0xff] }
 0x438   :  { %v2861_v34 = vpack.c.bf16 %v1627_v29, %v1619_v28  ;;  %v1714_v28 = vld [vmem:[%s4577_s6 + $0x728] sm:$0xff] }
 0x439   :  { %2778 = vmatpush1.bf16.msra.mxu1 %v2777_v35  ;;  %2842 = vmatpush1.bf16.msra.mxu0 %v2841_v36  ;;  %v1633_v35 = vld [vmem:[%s4577_s6 + $0x4a0] sm:$0xff]  ;;  %v1722_v29 = vld [vmem:[%s4577_s6 + $0x768] sm:$0xff] }
 0x43a   :  { %2780 = vmatprep.subr.bf16.mxu1 %v2779_v39  ;;  %2844 = vmatprep.subr.bf16.mxu0 %v2843_v40  ;;  %v1641_v36 = vld [vmem:[%s4577_s6 + $0x4e0] sm:$0xff]  ;;  %v1635_v39 = vld [vmem:[%s4577_s6 + $0x4b0] sm:$0xff]  ;;  %v2072_v19 = vld [vmem:[%s4579_s8 + $0x48] sm:$0xff] }
 0x43b   :  { %v1643_v40 = vld [vmem:[%s4577_s6 + $0x4f0] sm:$0xff]  ;;  %v2801_v46 = vpack.c.bf16 %v1641_v36, %v1633_v35  ;;  %v2819_v35 = vpack.c.bf16 %v1722_v29, %v1714_v28  ;;  %v2883_v36 = vpack.c.bf16 %v1724_v31, %v1716_v30  ;;  %v2075_v30 = vld [vmem:[%s4579_s8 + $0x60] sm:$0xff]  ;;  %v2076_v31 = vld [vmem:[%s4579_s8 + $0x68] sm:$0xff] }
 0x43c   :  { %v2865_v47 = vpack.c.bf16 %v1643_v40, %v1635_v39  ;;  %v1730_v39 = vld [vmem:[%s4577_s6 + $0x7a8] sm:$0xff] }
 0x43d   :  { %2782 = vmatpush1.bf16.msra.mxu1 %v2781_v48  ;;  %2846 = vmatpush1.bf16.msra.mxu0 %v2845_v50  ;;  %v1649_v48 = vld [vmem:[%s4577_s6 + $0x520] sm:$0xff]  ;;  %v1738_v40 = vld [vmem:[%s4577_s6 + $0x7e8] sm:$0xff] }
 0x43e   :  { %2784 = vmatprep.subr.bf16.mxu1 %v2783_v53  ;;  %2848 = vmatprep.subr.bf16.mxu0 %v2847_v54  ;;  %v1657_v50 = vld [vmem:[%s4577_s6 + $0x560] sm:$0xff]  ;;  %v1651_v53 = vld [vmem:[%s4577_s6 + $0x530] sm:$0xff] }
 0x43f   :  { %v1659_v54 = vld [vmem:[%s4577_s6 + $0x570] sm:$0xff]  ;;  %v2805_v61 = vpack.c.bf16 %v1657_v50, %v1649_v48  ;;  %v2887_v48 = vpack.c.bf16 %v1740_v42, %v1732_v41  ;;  %v1737_v50 = vld [vmem:[%s4577_s6 + $0x7e0] sm:$0xff] }
 0x440   :  { %v2869_v62 = vpack.c.bf16 %v1659_v54, %v1651_v53 }
 0x441   :  { %2786 = vmatpush1.bf16.msra.mxu1 %v2785_v63  ;;  %2850 = vmatpush1.bf16.msra.mxu0 %v2849_v0  ;;  %v1665_v63 = vld [vmem:[%s4577_s6 + $0x5a0] sm:$0xff] }
 0x442   :  { %2788 = vmatprep.subr.bf16.mxu1 %v2787_v3  ;;  %2852 = vmatprep.subr.bf16.mxu0 %v2851_v4  ;;  %v1673_v0 = vld [vmem:[%s4577_s6 + $0x5e0] sm:$0xff]  ;;  %v1667_v3 = vld [vmem:[%s4577_s6 + $0x5b0] sm:$0xff] }
 0x443   :  { %v1675_v4 = vld [vmem:[%s4577_s6 + $0x5f0] sm:$0xff]  ;;  %v2809_v9 = vpack.c.bf16 %v1673_v0, %v1665_v63  ;;  %v2082_v63 = vld [vmem:[%s4579_s8 + $0x98] sm:$0xff] }
 0x444   :  { %v2873_v10 = vpack.c.bf16 %v1675_v4, %v1667_v3  ;;  %v2083_v4 = vld [vmem:[%s4579_s8 + $0xa0] sm:$0xff] }
 0x445   :  { %2790 = vmatpush1.bf16.msra.mxu1 %v2789_v11  ;;  %2854 = vmatpush1.bf16.msra.mxu0 %v2853_v12  ;;  %v1681_v11 = vld [vmem:[%s4577_s6 + $0x620] sm:$0xff]  ;;  %v2899_v6 = vpack.c.bf16 %v2084_v5, %v2083_v4 }
 0x446   :  { %2792 = vmatprep.subr.bf16.mxu1 %v2791_v15  ;;  %2856 = vmatprep.subr.bf16.mxu0 %v2855_v16  ;;  %v1689_v12 = vld [vmem:[%s4577_s6 + $0x660] sm:$0xff]  ;;  %v1683_v15 = vld [vmem:[%s4577_s6 + $0x630] sm:$0xff] }
 0x447   :  { %v1691_v16 = vld [vmem:[%s4577_s6 + $0x670] sm:$0xff]  ;;  %v2813_v20 = vpack.c.bf16 %v1689_v12, %v1681_v11  ;;  %v2086_v11 = vld [vmem:[%s4579_s8 + $0xb8] sm:$0xff]  ;;  %v1484_v4 = vld [vmem:[#allocation6 + $0x10] sm:$0xcc] }
 0x448   :  { %v2877_v21 = vpack.c.bf16 %v1691_v16, %v1683_v15  ;;  %v2087_v16 = vld [vmem:[%s4579_s8 + $0xc0] sm:$0xff] }
 0x449   :  { %2794 = vmatpush1.bf16.msra.mxu1 %v2793_v22  ;;  %2858 = vmatpush1.bf16.msra.mxu0 %v2857_v23  ;;  %v1697_v22 = vld [vmem:[%s4577_s6 + $0x6a0] sm:$0xff]  ;;  %v2907_v18 = vpack.c.bf16 %v2088_v17, %v2087_v16 }
 0x44a   :  { %2796 = vmatprep.subr.bf16.mxu1 %v2795_v26  ;;  %2860 = vmatprep.subr.bf16.mxu0 %v2859_v27  ;;  %v1705_v23 = vld [vmem:[%s4577_s6 + $0x6e0] sm:$0xff]  ;;  %v1699_v26 = vld [vmem:[%s4577_s6 + $0x6b0] sm:$0xff] }
 0x44b   :  { %v1707_v27 = vld [vmem:[%s4577_s6 + $0x6f0] sm:$0xff]  ;;  %v2817_v57 = vpack.c.bf16 %v1705_v23, %v1697_v22  ;;  %v2909_v22 = vpack.c.bf16 %v2072_v19, %v2071_v44 }
 0x44c   :  { %v2881_v32 = vpack.c.bf16 %v1707_v27, %v1699_v26  ;;  %v2091_v26 = vld [vmem:[%s4579_s8 + $0xe0] sm:$0xff]  ;;  %v2092_v27 = vld [vmem:[%s4579_s8 + $0xe8] sm:$0xff] }
 0x44d   :  { %2798 = vmatpush1.bf16.msra.mxu1 %v2797_v33  ;;  %2862 = vmatpush1.bf16.msra.mxu0 %v2861_v34  ;;  %v1713_v33 = vld [vmem:[%s4577_s6 + $0x720] sm:$0xff]  ;;  %v2915_v29 = vpack.c.bf16 %v2092_v27, %v2091_v26 }
 0x44e   :  { %2800 = vmatprep.subr.bf16.mxu1 %v2799_v37  ;;  %2864 = vmatprep.subr.bf16.mxu0 %v2863_v38  ;;  %v1721_v34 = vld [vmem:[%s4577_s6 + $0x760] sm:$0xff]  ;;  %v1715_v37 = vld [vmem:[%s4577_s6 + $0x730] sm:$0xff] }
 0x44f   :  { %v1723_v38 = vld [vmem:[%s4577_s6 + $0x770] sm:$0xff]  ;;  %v2821_v43 = vpack.c.bf16 %v1721_v34, %v1713_v33  ;;  %v2917_v33 = vpack.c.bf16 %v2076_v31, %v2075_v30 }
 0x450   :  { %v2885_v45 = vpack.c.bf16 %v1723_v38, %v1715_v37 }
 0x451   :  { %2802 = vmatpush1.bf16.msra.mxu1 %v2801_v46  ;;  %2866 = vmatpush1.bf16.msra.mxu0 %v2865_v47  ;;  %v1729_v46 = vld [vmem:[%s4577_s6 + $0x7a0] sm:$0xff]  ;;  %v2823_v47 = vpack.c.bf16 %v1738_v40, %v1730_v39 }
 0x452   :  { %2804 = vmatprep.subr.bf16.mxu1 %v2803_v51  ;;  %2868 = vmatprep.subr.bf16.mxu0 %v2867_v52  ;;  %v1731_v51 = vld [vmem:[%s4577_s6 + $0x7b0] sm:$0xff]  ;;  %v2825_v53 = vpack.c.bf16 %v1737_v50, %v1729_v46  ;;  %v1483_v46 = vld [vmem:[#allocation6 + $0x8] sm:$0xcc] }
 0x453   :  { %v1739_v52 = vld [vmem:[%s4577_s6 + $0x7f0] sm:$0xff] }
 0x454   :  { %v2889_v54 = vpack.c.bf16 %v1739_v52, %v1731_v51  ;;  %v2058_v52 = vrot.slane %v4076_v49, 6 }
 0x455   :  { %2806 = vmatpush1.bf16.msra.mxu1 %v2805_v61  ;;  %2870 = vmatpush1.bf16.msra.mxu0 %v2869_v62  ;;  %v2064_v61 = vld [vmem:[%s4579_s8 + $0x8] sm:$0xff] }
 0x456   :  { %2808 = vmatprep.subr.bf16.mxu1 %v2807_v1  ;;  %2872 = vmatprep.subr.bf16.mxu0 %v2871_v2  ;;  %v2893_v62 = vpack.c.bf16 %v2064_v61, %v2063_v59  ;;  %v2065_v1 = vld [vmem:[%s4579_s8 + $0x10] sm:$0xff]  ;;  %v2066_v2 = vld [vmem:[%s4579_s8 + $0x18] sm:$0xff] }
 0x457   :  { %v2897_v3 = vpack.c.bf16 %v2066_v2, %v2065_v1 }
 0x459   :  { %2810 = vmatpush1.bf16.msra.mxu1 %v2809_v9  ;;  %2874 = vmatpush1.bf16.msra.mxu0 %v2873_v10  ;;  %v2901_v9 = vpack.c.bf16 %v2068_v8, %v2067_v7  ;;  %v2085_v10 = vld [vmem:[%s4579_s8 + $0xb0] sm:$0xff] }
 0x45a   :  { %2812 = vmatprep.subr.bf16.mxu1 %v2811_v13  ;;  %2876 = vmatprep.subr.bf16.mxu0 %v2875_v14  ;;  %v2903_v12 = vpack.c.bf16 %v2086_v11, %v2085_v10  ;;  %v2069_v13 = vld [vmem:[%s4579_s8 + $0x30] sm:$0xff]  ;;  %v2070_v14 = vld [vmem:[%s4579_s8 + $0x38] sm:$0xff] }
 0x45b   :  { %v2905_v15 = vpack.c.bf16 %v2070_v14, %v2069_v13  ;;  %v2205_v13 = vld [vmem:[%s4580_s9] ss:$0 sm:$0xff] }
 0x45d   :  { %2814 = vmatpush1.bf16.msra.mxu1 %v2813_v20  ;;  %2878 = vmatpush1.bf16.msra.mxu0 %v2877_v21  ;;  %v2089_v20 = vld [vmem:[%s4579_s8 + $0xd0] sm:$0xff]  ;;  %v2090_v21 = vld [vmem:[%s4579_s8 + $0xd8] sm:$0xff] }
 0x45e   :  { %2816 = vmatprep.subr.bf16.mxu1 %v2815_v24  ;;  %2880 = vmatprep.subr.bf16.mxu0 %v2879_v25  ;;  %v2911_v23 = vpack.c.bf16 %v2090_v21, %v2089_v20  ;;  %v2073_v24 = vld [vmem:[%s4579_s8 + $0x50] sm:$0xff]  ;;  %v2074_v25 = vld [vmem:[%s4579_s8 + $0x58] sm:$0xff] }
 0x45f   :  { %v2913_v28 = vpack.c.bf16 %v2074_v25, %v2073_v24 }
 0x461   :  { %2818 = vmatpush1.bf16.msra.mxu1 %v2817_v57  ;;  %2882 = vmatpush1.bf16.msra.mxu0 %v2881_v32  ;;  %v2093_v57 = vld [vmem:[%s4579_s8 + $0xf0] sm:$0xff]  ;;  %v2094_v32 = vld [vmem:[%s4579_s8 + $0xf8] sm:$0xff] }
 0x462   :  { %2820 = vmatprep.subr.bf16.mxu1 %v2819_v35  ;;  %2884 = vmatprep.subr.bf16.mxu0 %v2883_v36  ;;  %v2919_v34 = vpack.c.bf16 %v2094_v32, %v2093_v57  ;;  %v2077_v35 = vld [vmem:[%s4579_s8 + $0x70] sm:$0xff]  ;;  %v2078_v36 = vld [vmem:[%s4579_s8 + $0x78] sm:$0xff] }
 0x463   :  { %v2921_v37 = vpack.c.bf16 %v2078_v36, %v2077_v35 }
 0x465   :  { %2822 = vmatpush1.bf16.msra.mxu1 %v2821_v43  ;;  %2886 = vmatpush1.bf16.msra.mxu0 %v2885_v45 }
 0x466   :  { %2824 = vmatprep.subr.bf16.mxu1 %v2823_v47  ;;  %2888 = vmatprep.subr.bf16.mxu0 %v2887_v48 }
 0x469   :  { %2826 = vmatpush1.bf16.msra.mxu1 %v2825_v53  ;;  %2890 = vmatpush1.bf16.msra.mxu0 %v2889_v54 }
 0x46a   :  { %2892 = vmatprep.subr.bf16.mxu1 %v2891_v56 }
 0x46c   :  { %1951 = vmatmul.mubr.f32.vlgmr.msra.gmra.mrb[14].mxu1 %v4091_v60  ;;  %2022 = vmatmul.mubr.f32.vlgmr.msra.gmra.mrb[72].mxu0 %v4091_v60  ;;  %v2081_v60 = vld [vmem:[%s4579_s8 + $0x90] sm:$0xff] }
 0x46d   :  { %2894 = vmatpush3.bf16.msra.mxu1 %v2893_v62  ;;  %v2895_v0 = vpack.c.bf16 %v2082_v63, %v2081_v60 }
 0x46f   :  { %2896 = vmatprep.subr.bf16.mxu1 %v2895_v0 }
 0x471   :  { %2898 = vmatpush3.bf16.msra.mxu1 %v2897_v3 }
 0x472   :  { %2900 = vmatprep.subr.bf16.mxu1 %v2899_v6 }
 0x475   :  { %2902 = vmatpush3.bf16.msra.mxu1 %v2901_v9 }
 0x476   :  { %2904 = vmatprep.subr.bf16.mxu1 %v2903_v12 }
 0x479   :  { %2906 = vmatpush3.bf16.msra.mxu1 %v2905_v15 }
 0x47a   :  { %2908 = vmatprep.subr.bf16.mxu1 %v2907_v18 }
 0x47d   :  { %2910 = vmatpush3.bf16.msra.mxu1 %v2909_v22 }
 0x47e   :  { %2912 = vmatprep.subr.bf16.mxu1 %v2911_v23 }
 0x481   :  { %2914 = vmatpush3.bf16.msra.mxu1 %v2913_v28 }
 0x482   :  { %2916 = vmatprep.subr.bf16.mxu1 %v2915_v29 }
 0x485   :  { %2918 = vmatpush3.bf16.msra.mxu1 %v2917_v33 }
 0x486   :  { %2920 = vmatprep.subr.bf16.mxu1 %v2919_v34 }
 0x489   :  { %2922 = vmatpush3.bf16.msra.mxu1 %v2921_v37 }
 0x4ff   :  { %v1810_v38 = vpop.f32.mrb[12].mxu1  ;;  %v1881_v39 = vpop.f32.mrb[70].mxu0 }
 0x500   :  { %v1812_v40 = vpop.f32.mrb[13].mxu1  ;;  %v1883_v41 = vpop.f32.mrb[71].mxu0 }
 0x501   :  { %v2032_v42 = vcombine.low %v1810_v38, %v1812_v40  ;;  %v2033_v43 = vcombine.low %v1881_v39, %v1883_v41 }
 0x503   :  { %v2036_v45 = vrot.slane %v2033_v43, 6  ;;  %v2035_v55 = vrot.slane %v2032_v42, 6 }
 0x505   :  { %v2042_v47 = vadd.f32 %v2036_v45, %v1483_v46  ;;  %v2041_v59 = vadd.f32 %v2035_v55, %v1482_v58 }
 0x507   :  { %v2204_v48 = vmul.f32 -1.442695, %v2042_v47  ;;  %v2203_v56 = vmul.f32 -1.442695, %v2041_v59 }
 0x509   :  { %2981 = vpow2.f32 %v2204_v48 }
 0x513   :  { %v2982_v50 = vpop.eup %2981 }
 0x514   :  { %v2054_v51 = vadd.f32 1.0, %v2982_v50 }
 0x516   :  { %2983 = vrcp.f32 %v2054_v51 }
 0x517   :  { %2985 = vpow2.f32 %v2203_v56 }
 0x520   :  { %v2984_v53 = vpop.eup %2983 }
 0x521   :  { %v2060_v54 = vmul.f32 %v2984_v53, %v2058_v52  ;;  %v2986_v61 = vpop.eup %2985 }
 0x522   :  { %v2047_v2 = vadd.f32 1.0, %v2986_v61 }
 0x524   :  { %2987 = vrcp.f32 %v2047_v2 }
 0x52e   :  { %v2988_v49 = vpop.eup %2987 }
 0x53f   :  { %v1952_v62 = vpop.f32.mrb[14].mxu1  ;;  %v2023_v60 = vpop.f32.mrb[72].mxu0 }
 0x540   :  { %v1954_v63 = vpop.f32.mrb[15].mxu1  ;;  %v2024_v0 = vpop.f32.mrb[73].mxu0 }
 0x541   :  { %v2034_v1 = vcombine.low %v1952_v62, %v1954_v63 }
 0x543   :  { %v2037_v3 = vrot.slane %v2034_v1, 6 }
 0x545   :  { %v2043_v5 = vadd.f32 %v2037_v3, %v1484_v4 }
 0x547   :  { %2989 = vtanh.f32 %v2043_v5 }
 0x551   :  { %v2990_v6 = vpop.eup %2989 }
 0x552   :  { %v2061_v7 = vmul.f32 %v2990_v6, %v2988_v49 }
 0x554   :  { %v2062_v8 = vadd.f32 %v2061_v7, %v2060_v54 }
 0x556   :  { %v2103_v9 = vcombine.high %v2062_v8, %v2062_v8  ;;  %v2104_v11 = vrot.slane %v2062_v8, 2 }
 0x558   :  { %v2105_v10 = vrot.slane %v2103_v9, 2 }
 0x55a   :  { %2172 = vmatprep.mubr.f32.mxu1 %v2105_v10 }
 0x55b   :  { %2173 = vmatmul.mubr.f32.vlgmr.msra.gmra.mrb[16].mxu1 %v2104_v11 }
 0x62e   :  { %v2368_v12 = vpop.f32.mrb[16].mxu1 }
 0x62f   :  { %v2369_v14 = vpop.f32.mrb[17].mxu1 }
 0x630   :  { %v2370_v15 = vadd.f32 %v2369_v14, %v2368_v12 }
 0x632   :  { %v2175_v16 = vadd.f32 %v2370_v15, %v2205_v13 }
 0x634   :  { %2179 = vst.msk [vmem:[#allocation7] sm:$0x3] %vm2178_vm9, %v2175_v16 }
 0x635   :  { %3002 = shalt.err (!%p2999_p4)
}
 0x636   :  { %s3003_s28 = scalar_lea.hbm %s4581_s10, 32 }
 0x637   :  { %p3004_p5 = scmp.ne.s32.totalorder %s4581_s10, %s3003_s28  ;;  %p3007_p6 = scmp.lt.u32.totalorder %s3003_s28, %s4581_s10 }
 0x639   :  { %p3009_p7 = pnand %p3007_p6, %p3004_p5 }
 0x63b   :  { %3012 = shalt.err (!%p3009_p7)
}
 0x63c   :  { %2189 = dma.vmem_to_hbm [thread:$0]  %s2187_s2, 32, %s4581_s10, [#allocation8]  }
 0x63d   :  { %3013 = dma.done.wait [#allocation8], 32  }
 0x63e   :  { %3014 = vsyncadd [#allocation8], 4294967264 }
 0x63f   :  { %2193 = vsyncpa [#allocation8], 1 }

</bundles_post_ra>
